<compile_context>
chip_gen: v6e
topology: v6e:2x2x1
jax: 0.10.0
libtpu: 0.0.40
codegen_flags: <defaults>
</compile_context>

<pallas_src>
import functools

import jax
import jax.numpy as jnp
from jax.experimental import pallas as pl
from jax.experimental.pallas import tpu as pltpu


NEG_INF = -1e30   # additive mask for non-edges (stays in f32, never cast to bf16)


# ---------------------------------------------------------------------------
# Fused forward kernel: 3 GAT layers -> fc1 -> fc2 -> softmax -> NCut loss
# ---------------------------------------------------------------------------
def fused_forward_kernel(x_ref, masks_ref, blob_ref, loss_ref, *,
                         offsets, heads, f_ins, f_outs, neg_slope):
    f32 = jnp.float32
    n = x_ref.shape[0]

    def param(name):
        r, nr, nc = offsets[name]                   # static python ints
        return blob_ref[r:r + nr, 0:nc]

    def gat_layer(h_in, layer):
        f_in, f_out = f_ins[layer], f_outs[layer]
        w = param(f"w{layer}").reshape(heads, f_in, f_out)     # [H, Fin, Fout]
        a_src = param(f"asrc{layer}")                          # [H, Fout]
        a_dst = param(f"adst{layer}")                          # [H, Fout]
        bias = param(f"b{layer}")                              # [1, Fout]
        neg_bias = masks_ref[layer]                            # [N, N] additive mask

        # per-head projection: ONE batched MXU matmul (bf16 operands, f32 acc)
        hb = jnp.broadcast_to(h_in.astype(jnp.bfloat16)[None], (heads, n, f_in))
        hfeat = jnp.einsum("hnc,hcf->hnf", hb, w.astype(jnp.bfloat16),
                           preferred_element_type=f32)         # [H, N, Fout]

        # attention logits for ALL heads at once:
        #   e[h,i,j] = a_dst_h . hfeat[h,i] + a_src_h . hfeat[h,j]
        a_dst_col = jnp.sum(hfeat * a_dst[:, None, :], axis=-1,
                            keepdims=True)                     # [H, N, 1]
        a_src_row = jnp.einsum("hkf,hnf->hkn", a_src[:, None, :], hfeat,
                               preferred_element_type=f32)     # [H, 1, N]
        e = a_dst_col + a_src_row                              # [H, N, N]
        e = jnp.where(e >= 0, e, neg_slope * e)                # LeakyReLU, 1 issue/layer
        e = e + neg_bias[None, :, :]                           # -1e30 on non-edges

        # softmax over source nodes (axis -1), all heads in one issue sequence;
        # self-loops guarantee a finite row max so masked entries underflow to 0.
        m = jnp.max(e, axis=-1, keepdims=True)                 # [H, N, 1]
        p = jnp.exp(e - m)
        inv_den = pl.reciprocal(jnp.sum(p, axis=-1, keepdims=True), approx=True)
        attn = p * inv_den                                     # [H, N, N]

        # aggregation + mean over heads (f32 matmul keeps attention rows exact)
        out = jnp.einsum("hij,hjf->hif", attn, hfeat,
                         preferred_element_type=f32)           # [H, N, Fout]
        return jnp.sum(out, axis=0) * f32(1.0 / heads) + bias  # [N, Fout]

    # --- encoder: 3 dilated GAT layers (hops 1, 3, 9) ---
    h = x_ref[...]
    for layer in range(3):
        h = gat_layer(h, layer)

    # --- fc1 -> fc2 (no nonlinearity between) -> softmax over classes ---
    z = jnp.dot(h, param("fc1_w"), preferred_element_type=f32) + param("fc1_b")
    z = jnp.dot(z, param("fc2_w"), preferred_element_type=f32) + param("fc2_b")
    zm = jnp.max(z, axis=1, keepdims=True)
    ez = jnp.exp(z - zm)
    y = ez / jnp.sum(ez, axis=1, keepdims=True)                # [N, C] exact softmax

    # --- NCut (GAP relaxation): sum_k (y_k^T A (1 - y_k)) / (y_k^T A 1) ---
    a = masks_ref[3]                                           # [N, N]
    d = jnp.sum(a, axis=1, keepdims=True)                      # [N, 1] degrees
    ay = jnp.dot(a, y, preferred_element_type=f32)             # [N, C]
    cut = d - ay                                               # A(1-y) = d - A y
    gamma = jnp.sum(y * d, axis=0, keepdims=True)              # [1, C] = d^T y
    loss = jnp.sum((y * cut) / (gamma + 1e-12))                # exact division
    loss_ref[0, 0] = loss                                      # scalar out via SMEM


# ---------------------------------------------------------------------------
# Host-side packing helpers + wrapper (one pallas_call, 3 inputs)
# ---------------------------------------------------------------------------
def _pack_blob(entries):
    """Concatenate 2-D f32 params into one [R, W] blob; every param starts at
    an 8-aligned row so the in-kernel static slices stay sublane-tile aligned."""
    width = max(arr.shape[1] for _, arr in entries)
    offsets, chunks, r = {}, [], 0
    for name, arr in entries:
        arr = jnp.asarray(arr, jnp.float32)
        nr, nc = arr.shape
        nr_pad = -(-nr // 8) * 8
        chunk = jnp.zeros((nr_pad, width), jnp.float32).at[:nr, :nc].set(arr)
        offsets[name] = (r, nr, nc)
        chunks.append(chunk)
        r += nr_pad
    return jnp.concatenate(chunks, axis=0), offsets


def network_forward(node_features, edge_masks, adjacency, params, *,
                    negative_slope=0.2):
    """One fused pallas_call for the whole `Netwrok` forward. Returns (1,1) loss."""
    n, f_in0 = node_features.shape
    heads = params["heads"]
    f_outs = tuple(p["f_out"] for p in params["gat"])
    f_ins = (f_in0,) + f_outs[:-1]

    # masks + A -> one [4, N, N] tensor; edge test + -1e30 bias precomputed here
    eye = jnp.eye(n, dtype=jnp.float32)
    planes = [jnp.where(jnp.maximum(m, eye) > 0, 0.0, NEG_INF).astype(jnp.float32)
              for m in edge_masks]                             # self-loops (PyG default)
    planes.append(adjacency.astype(jnp.float32))
    masks_packed = jnp.stack(planes, axis=0)                   # [4, N, N] -> one DMA

    # all weights / biases -> one f32 blob with static offsets
    entries = []
    for l, (p, fi) in enumerate(zip(params["gat"], f_ins)):
        fo = p["f_out"]
        # [Fin, H*Fout] -> per-head stack [H*Fin, Fout] (rows h*Fin + c)
        w_stk = p["w"].reshape(fi, heads, fo).transpose(1, 0, 2).reshape(heads * fi, fo)
        entries += [(f"w{l}", w_stk),
                    (f"asrc{l}", p["a_src"]),
                    (f"adst{l}", p["a_dst"]),
                    (f"b{l}", p["bias"].reshape(1, fo))]
    entries += [("fc1_w", params["fc1_w"]),
                ("fc1_b", params["fc1_b"].reshape(1, -1)),
                ("fc2_w", params["fc2_w"]),
                ("fc2_b", params["fc2_b"].reshape(1, -1))]
    blob, offsets = _pack_blob(entries)                        # [~440, 32] -> one DMA

    kernel = functools.partial(
        fused_forward_kernel, offsets=offsets, heads=heads,
        f_ins=f_ins, f_outs=f_outs, neg_slope=negative_slope)

    vmem = pltpu.MemorySpace.VMEM
    return pl.pallas_call(
        kernel,
        out_shape=jax.ShapeDtypeStruct((1, 1), jnp.float32),
        in_specs=[pl.BlockSpec(memory_space=vmem)] * 3,
        out_specs=pl.BlockSpec(memory_space=pltpu.MemorySpace.SMEM),
    )(node_features.astype(jnp.float32), masks_packed, blob)


# ---------------------------------------------------------------------------
# Example run
# ---------------------------------------------------------------------------
if __name__ == "__main__":
    N = 16               # nodes
    F_IN = 32            # in_channels
    OUT = [32, 16, 16]   # out_channels (last two equal -> fc1 dims consistent)
    HEADS = 4
    NCLASS = 4

    key = jax.random.PRNGKey(0)
    keys = iter(jax.random.split(key, 32))

    # node features
    x = jax.random.normal(next(keys), (N, F_IN), jnp.float32)

    # per-hop dense adjacency masks (edge j->i); self-loops added in the wrapper
    edge_masks = [jax.random.bernoulli(next(keys), 0.3, (N, N)).astype(jnp.float32)
                  for _hop in (1, 3, 9)]

    # adjacency for the NCut loss: symmetric, no self-loops
    eye = jnp.eye(N, dtype=jnp.float32)
    b = jax.random.bernoulli(next(keys), 0.3, (N, N)).astype(jnp.float32)
    A = jnp.clip(b + b.T, 0.0, 1.0) * (1.0 - eye)

    def init(shape, scale):
        return scale * jax.random.normal(next(keys), shape, jnp.float32)

    gat_params = []
    f_in = F_IN
    for f_out in OUT:
        gat_params.append(dict(
            w=init((f_in, HEADS * f_out), (1.0 / f_in) ** 0.5),   # [in, H*out]
            a_src=init((HEADS, f_out), (1.0 / f_out) ** 0.5),
            a_dst=init((HEADS, f_out), (1.0 / f_out) ** 0.5),
            bias=init((f_out,), 0.01),
            f_out=f_out))
        f_in = f_out

    params = dict(
        gat=gat_params, heads=HEADS,
        fc1_w=init((OUT[-2], OUT[-1]), (1.0 / OUT[-2]) ** 0.5),   # [in, out]
        fc1_b=init((OUT[-1],), 0.01),
        fc2_w=init((OUT[-1], NCLASS), (1.0 / OUT[-1]) ** 0.5),
        fc2_b=init((NCLASS,), 0.01),
    )

    loss = network_forward(x, edge_masks, A, params)
    jax.block_until_ready(loss)
    assert loss.shape == (1, 1) and bool(jnp.isfinite(loss[0, 0]))
    print("KERNEL_OK")
</pallas_src>

<mosaic_0001>
module attributes {stable_mosaic.version = 11 : i64} {
  func.func @fused_forward_kernel(%arg0: memref<16x32xf32, #tpu.memory_space<vmem>>, %arg1: memref<4x16x16xf32, #tpu.memory_space<vmem>>, %arg2: memref<440x32xf32, #tpu.memory_space<vmem>>, %arg3: memref<1x1xf32, #tpu.memory_space<smem>>) attributes {dimension_semantics = [], scalar_prefetch = 0 : i64, scratch_operands = 0 : i64, tpu.core_type = #tpu.core_type<tc>} {
    %c0 = arith.constant 0 : index
    %c0_0 = arith.constant 0 : index
    %0 = vector.load %arg0[%c0, %c0_0] : memref<16x32xf32, #tpu.memory_space<vmem>>, vector<16x32xf32>
    %c0_1 = arith.constant 0 : index
    %c0_2 = arith.constant 0 : index
    %1 = vector.load %arg2[%c0_1, %c0_2] : memref<440x32xf32, #tpu.memory_space<vmem>>, vector<128x32xf32>
    %2 = vector.shape_cast %1 : vector<128x32xf32> to vector<4x32x32xf32>
    %c128 = arith.constant 128 : index
    %c0_3 = arith.constant 0 : index
    %3 = vector.load %arg2[%c128, %c0_3] : memref<440x32xf32, #tpu.memory_space<vmem>>, vector<4x32xf32>
    %c136 = arith.constant 136 : index
    %c0_4 = arith.constant 0 : index
    %4 = vector.load %arg2[%c136, %c0_4] : memref<440x32xf32, #tpu.memory_space<vmem>>, vector<4x32xf32>
    %c144 = arith.constant 144 : index
    %c0_5 = arith.constant 0 : index
    %5 = vector.load %arg2[%c144, %c0_5] : memref<440x32xf32, #tpu.memory_space<vmem>>, vector<1x32xf32>
    %c0_6 = arith.constant 0 : index
    %c0_7 = arith.constant 0 : index
    %c0_8 = arith.constant 0 : index
    %6 = vector.load %arg1[%c0_6, %c0_7, %c0_8] : memref<4x16x16xf32, #tpu.memory_space<vmem>>, vector<1x16x16xf32>
    %7 = vector.shape_cast %6 : vector<1x16x16xf32> to vector<16x16xf32>
    %8 = arith.truncf %0 : vector<16x32xf32> to vector<16x32xbf16>
    %9 = vector.shape_cast %8 : vector<16x32xbf16> to vector<1x16x32xbf16>
    %10 = vector.shape_cast %9 : vector<1x16x32xbf16> to vector<1x16x32xbf16>
    %11 = vector.broadcast %10 : vector<1x16x32xbf16> to vector<4x16x32xbf16>
    %12 = arith.truncf %2 : vector<4x32x32xf32> to vector<4x32x32xbf16>
    "tpu.trace_start"() <{level = 10 : i32, message = "hnc,hcf->hnf"}> : () -> ()
    %cst = arith.constant dense<0.000000e+00> : vector<4x16x32xf32>
    %13 = tpu.matmul %11, %12, %cst {dimension_numbers = #tpu.dot_dimension_numbers<[2], [1], [1], [2], [0, 0, 0, 1, 1, 2], [0], [0]>} : vector<4x16x32xbf16>, vector<4x32x32xbf16>, vector<4x16x32xf32> -> vector<4x16x32xf32>
    "tpu.trace_stop"() : () -> ()
    %14 = vector.shape_cast %4 : vector<4x32xf32> to vector<4x1x32xf32>
    %15 = vector.broadcast %14 : vector<4x1x32xf32> to vector<4x16x32xf32>
    %16 = arith.mulf %13, %15 : vector<4x16x32xf32>
    %cst_9 = arith.constant dense<0.000000e+00> : vector<4x16xf32>
    %17 = vector.multi_reduction <add>, %16, %cst_9 [2] : vector<4x16x32xf32> to vector<4x16xf32>
    %18 = vector.shape_cast %17 : vector<4x16xf32> to vector<4x16x1xf32>
    %19 = vector.shape_cast %3 : vector<4x32xf32> to vector<4x1x32xf32>
    "tpu.trace_start"() <{level = 10 : i32, message = "hkf,hnf->hkn"}> : () -> ()
    %cst_10 = arith.constant dense<0.000000e+00> : vector<4x1x16xf32>
    %20 = tpu.matmul %19, %13, %cst_10 {dimension_numbers = #tpu.dot_dimension_numbers<[2], [2], [1], [1], [0, 0, 0, 1, 1, 1], [0], [0]>} : vector<4x1x32xf32>, vector<4x16x32xf32>, vector<4x1x16xf32> -> vector<4x1x16xf32>
    "tpu.trace_stop"() : () -> ()
    %21 = vector.broadcast %18 : vector<4x16x1xf32> to vector<4x16x16xf32>
    %22 = vector.broadcast %20 : vector<4x1x16xf32> to vector<4x16x16xf32>
    %23 = arith.addf %21, %22 : vector<4x16x16xf32>
    %cst_11 = arith.constant 0.000000e+00 : f32
    %24 = vector.broadcast %cst_11 : f32 to vector<4x16x16xf32>
    %25 = arith.cmpf oge, %23, %24 : vector<4x16x16xf32>
    %cst_12 = arith.constant 2.000000e-01 : f32
    %26 = vector.broadcast %cst_12 : f32 to vector<4x16x16xf32>
    %27 = arith.mulf %26, %23 : vector<4x16x16xf32>
    %28 = arith.select %25, %23, %27 : vector<4x16x16xi1>, vector<4x16x16xf32>
    %29 = vector.shape_cast %7 : vector<16x16xf32> to vector<1x16x16xf32>
    %30 = vector.broadcast %29 : vector<1x16x16xf32> to vector<4x16x16xf32>
    %31 = arith.addf %28, %30 : vector<4x16x16xf32>
    %cst_13 = arith.constant dense<0xFF800000> : vector<4x16xf32>
    %32 = vector.multi_reduction <maximumf>, %31, %cst_13 [2] : vector<4x16x16xf32> to vector<4x16xf32>
    %33 = vector.shape_cast %32 : vector<4x16xf32> to vector<4x16x1xf32>
    %34 = vector.broadcast %33 : vector<4x16x1xf32> to vector<4x16x16xf32>
    %35 = arith.subf %31, %34 : vector<4x16x16xf32>
    %36 = math.exp %35 : vector<4x16x16xf32>
    %cst_14 = arith.constant dense<0.000000e+00> : vector<4x16xf32>
    %37 = vector.multi_reduction <add>, %36, %cst_14 [2] : vector<4x16x16xf32> to vector<4x16xf32>
    %38 = vector.shape_cast %37 : vector<4x16xf32> to vector<4x16x1xf32>
    %39 = tpu.reciprocal %38 {approx = true} : vector<4x16x1xf32> -> vector<4x16x1xf32>
    %40 = vector.broadcast %39 : vector<4x16x1xf32> to vector<4x16x16xf32>
    %41 = arith.mulf %36, %40 : vector<4x16x16xf32>
    "tpu.trace_start"() <{level = 10 : i32, message = "hij,hjf->hif"}> : () -> ()
    %cst_15 = arith.constant dense<0.000000e+00> : vector<4x16x32xf32>
    %42 = tpu.matmul %41, %13, %cst_15 {dimension_numbers = #tpu.dot_dimension_numbers<[2], [1], [1], [2], [0, 0, 0, 1, 1, 2], [0], [0]>} : vector<4x16x16xf32>, vector<4x16x32xf32>, vector<4x16x32xf32> -> vector<4x16x32xf32>
    "tpu.trace_stop"() : () -> ()
    %cst_16 = arith.constant dense<0.000000e+00> : vector<16x32xf32>
    %43 = vector.multi_reduction <add>, %42, %cst_16 [0] : vector<4x16x32xf32> to vector<16x32xf32>
    %cst_17 = arith.constant 2.500000e-01 : f32
    %44 = vector.broadcast %cst_17 : f32 to vector<16x32xf32>
    %45 = arith.mulf %43, %44 : vector<16x32xf32>
    %46 = vector.broadcast %5 : vector<1x32xf32> to vector<16x32xf32>
    %47 = arith.addf %45, %46 : vector<16x32xf32>
    %c152 = arith.constant 152 : index
    %c0_18 = arith.constant 0 : index
    %48 = vector.load %arg2[%c152, %c0_18] : memref<440x32xf32, #tpu.memory_space<vmem>>, vector<128x16xf32>
    %49 = vector.shape_cast %48 : vector<128x16xf32> to vector<4x32x16xf32>
    %c280 = arith.constant 280 : index
    %c0_19 = arith.constant 0 : index
    %50 = vector.load %arg2[%c280, %c0_19] : memref<440x32xf32, #tpu.memory_space<vmem>>, vector<4x16xf32>
    %c288 = arith.constant 288 : index
    %c0_20 = arith.constant 0 : index
    %51 = vector.load %arg2[%c288, %c0_20] : memref<440x32xf32, #tpu.memory_space<vmem>>, vector<4x16xf32>
    %c296 = arith.constant 296 : index
    %c0_21 = arith.constant 0 : index
    %52 = vector.load %arg2[%c296, %c0_21] : memref<440x32xf32, #tpu.memory_space<vmem>>, vector<1x16xf32>
    %c1 = arith.constant 1 : index
    %c0_22 = arith.constant 0 : index
    %c0_23 = arith.constant 0 : index
    %53 = vector.load %arg1[%c1, %c0_22, %c0_23] : memref<4x16x16xf32, #tpu.memory_space<vmem>>, vector<1x16x16xf32>
    %54 = vector.shape_cast %53 : vector<1x16x16xf32> to vector<16x16xf32>
    %55 = arith.truncf %47 : vector<16x32xf32> to vector<16x32xbf16>
    %56 = vector.shape_cast %55 : vector<16x32xbf16> to vector<1x16x32xbf16>
    %57 = vector.shape_cast %56 : vector<1x16x32xbf16> to vector<1x16x32xbf16>
    %58 = vector.broadcast %57 : vector<1x16x32xbf16> to vector<4x16x32xbf16>
    %59 = arith.truncf %49 : vector<4x32x16xf32> to vector<4x32x16xbf16>
    "tpu.trace_start"() <{level = 10 : i32, message = "hnc,hcf->hnf"}> : () -> ()
    %cst_24 = arith.constant dense<0.000000e+00> : vector<4x16x16xf32>
    %60 = tpu.matmul %58, %59, %cst_24 {dimension_numbers = #tpu.dot_dimension_numbers<[2], [1], [1], [2], [0, 0, 0, 1, 1, 2], [0], [0]>} : vector<4x16x32xbf16>, vector<4x32x16xbf16>, vector<4x16x16xf32> -> vector<4x16x16xf32>
    "tpu.trace_stop"() : () -> ()
    %61 = vector.shape_cast %51 : vector<4x16xf32> to vector<4x1x16xf32>
    %62 = vector.broadcast %61 : vector<4x1x16xf32> to vector<4x16x16xf32>
    %63 = arith.mulf %60, %62 : vector<4x16x16xf32>
    %cst_25 = arith.constant dense<0.000000e+00> : vector<4x16xf32>
    %64 = vector.multi_reduction <add>, %63, %cst_25 [2] : vector<4x16x16xf32> to vector<4x16xf32>
    %65 = vector.shape_cast %64 : vector<4x16xf32> to vector<4x16x1xf32>
    %66 = vector.shape_cast %50 : vector<4x16xf32> to vector<4x1x16xf32>
    "tpu.trace_start"() <{level = 10 : i32, message = "hkf,hnf->hkn"}> : () -> ()
    %cst_26 = arith.constant dense<0.000000e+00> : vector<4x1x16xf32>
    %67 = tpu.matmul %66, %60, %cst_26 {dimension_numbers = #tpu.dot_dimension_numbers<[2], [2], [1], [1], [0, 0, 0, 1, 1, 1], [0], [0]>} : vector<4x1x16xf32>, vector<4x16x16xf32>, vector<4x1x16xf32> -> vector<4x1x16xf32>
    "tpu.trace_stop"() : () -> ()
    %68 = vector.broadcast %65 : vector<4x16x1xf32> to vector<4x16x16xf32>
    %69 = vector.broadcast %67 : vector<4x1x16xf32> to vector<4x16x16xf32>
    %70 = arith.addf %68, %69 : vector<4x16x16xf32>
    %cst_27 = arith.constant 0.000000e+00 : f32
    %71 = vector.broadcast %cst_27 : f32 to vector<4x16x16xf32>
    %72 = arith.cmpf oge, %70, %71 : vector<4x16x16xf32>
    %cst_28 = arith.constant 2.000000e-01 : f32
    %73 = vector.broadcast %cst_28 : f32 to vector<4x16x16xf32>
    %74 = arith.mulf %73, %70 : vector<4x16x16xf32>
    %75 = arith.select %72, %70, %74 : vector<4x16x16xi1>, vector<4x16x16xf32>
    %76 = vector.shape_cast %54 : vector<16x16xf32> to vector<1x16x16xf32>
    %77 = vector.broadcast %76 : vector<1x16x16xf32> to vector<4x16x16xf32>
    %78 = arith.addf %75, %77 : vector<4x16x16xf32>
    %cst_29 = arith.constant dense<0xFF800000> : vector<4x16xf32>
    %79 = vector.multi_reduction <maximumf>, %78, %cst_29 [2] : vector<4x16x16xf32> to vector<4x16xf32>
    %80 = vector.shape_cast %79 : vector<4x16xf32> to vector<4x16x1xf32>
    %81 = vector.broadcast %80 : vector<4x16x1xf32> to vector<4x16x16xf32>
    %82 = arith.subf %78, %81 : vector<4x16x16xf32>
    %83 = math.exp %82 : vector<4x16x16xf32>
    %cst_30 = arith.constant dense<0.000000e+00> : vector<4x16xf32>
    %84 = vector.multi_reduction <add>, %83, %cst_30 [2] : vector<4x16x16xf32> to vector<4x16xf32>
    %85 = vector.shape_cast %84 : vector<4x16xf32> to vector<4x16x1xf32>
    %86 = tpu.reciprocal %85 {approx = true} : vector<4x16x1xf32> -> vector<4x16x1xf32>
    %87 = vector.broadcast %86 : vector<4x16x1xf32> to vector<4x16x16xf32>
    %88 = arith.mulf %83, %87 : vector<4x16x16xf32>
    "tpu.trace_start"() <{level = 10 : i32, message = "hij,hjf->hif"}> : () -> ()
    %cst_31 = arith.constant dense<0.000000e+00> : vector<4x16x16xf32>
    %89 = tpu.matmul %88, %60, %cst_31 {dimension_numbers = #tpu.dot_dimension_numbers<[2], [1], [1], [2], [0, 0, 0, 1, 1, 2], [0], [0]>} : vector<4x16x16xf32>, vector<4x16x16xf32>, vector<4x16x16xf32> -> vector<4x16x16xf32>
    "tpu.trace_stop"() : () -> ()
    %cst_32 = arith.constant dense<0.000000e+00> : vector<16x16xf32>
    %90 = vector.multi_reduction <add>, %89, %cst_32 [0] : vector<4x16x16xf32> to vector<16x16xf32>
    %cst_33 = arith.constant 2.500000e-01 : f32
    %91 = vector.broadcast %cst_33 : f32 to vector<16x16xf32>
    %92 = arith.mulf %90, %91 : vector<16x16xf32>
    %93 = vector.broadcast %52 : vector<1x16xf32> to vector<16x16xf32>
    %94 = arith.addf %92, %93 : vector<16x16xf32>
    %c304 = arith.constant 304 : index
    %c0_34 = arith.constant 0 : index
    %95 = vector.load %arg2[%c304, %c0_34] : memref<440x32xf32, #tpu.memory_space<vmem>>, vector<64x16xf32>
    %96 = vector.shape_cast %95 : vector<64x16xf32> to vector<4x16x16xf32>
    %c368 = arith.constant 368 : index
    %c0_35 = arith.constant 0 : index
    %97 = vector.load %arg2[%c368, %c0_35] : memref<440x32xf32, #tpu.memory_space<vmem>>, vector<4x16xf32>
    %c376 = arith.constant 376 : index
    %c0_36 = arith.constant 0 : index
    %98 = vector.load %arg2[%c376, %c0_36] : memref<440x32xf32, #tpu.memory_space<vmem>>, vector<4x16xf32>
    %c384 = arith.constant 384 : index
    %c0_37 = arith.constant 0 : index
    %99 = vector.load %arg2[%c384, %c0_37] : memref<440x32xf32, #tpu.memory_space<vmem>>, vector<1x16xf32>
    %c2 = arith.constant 2 : index
    %c0_38 = arith.constant 0 : index
    %c0_39 = arith.constant 0 : index
    %100 = vector.load %arg1[%c2, %c0_38, %c0_39] : memref<4x16x16xf32, #tpu.memory_space<vmem>>, vector<1x16x16xf32>
    %101 = vector.shape_cast %100 : vector<1x16x16xf32> to vector<16x16xf32>
    %102 = arith.truncf %94 : vector<16x16xf32> to vector<16x16xbf16>
    %103 = vector.shape_cast %102 : vector<16x16xbf16> to vector<1x16x16xbf16>
    %104 = vector.shape_cast %103 : vector<1x16x16xbf16> to vector<1x16x16xbf16>
    %105 = vector.broadcast %104 : vector<1x16x16xbf16> to vector<4x16x16xbf16>
    %106 = arith.truncf %96 : vector<4x16x16xf32> to vector<4x16x16xbf16>
    "tpu.trace_start"() <{level = 10 : i32, message = "hnc,hcf->hnf"}> : () -> ()
    %cst_40 = arith.constant dense<0.000000e+00> : vector<4x16x16xf32>
    %107 = tpu.matmul %105, %106, %cst_40 {dimension_numbers = #tpu.dot_dimension_numbers<[2], [1], [1], [2], [0, 0, 0, 1, 1, 2], [0], [0]>} : vector<4x16x16xbf16>, vector<4x16x16xbf16>, vector<4x16x16xf32> -> vector<4x16x16xf32>
    "tpu.trace_stop"() : () -> ()
    %108 = vector.shape_cast %98 : vector<4x16xf32> to vector<4x1x16xf32>
    %109 = vector.broadcast %108 : vector<4x1x16xf32> to vector<4x16x16xf32>
    %110 = arith.mulf %107, %109 : vector<4x16x16xf32>
    %cst_41 = arith.constant dense<0.000000e+00> : vector<4x16xf32>
    %111 = vector.multi_reduction <add>, %110, %cst_41 [2] : vector<4x16x16xf32> to vector<4x16xf32>
    %112 = vector.shape_cast %111 : vector<4x16xf32> to vector<4x16x1xf32>
    %113 = vector.shape_cast %97 : vector<4x16xf32> to vector<4x1x16xf32>
    "tpu.trace_start"() <{level = 10 : i32, message = "hkf,hnf->hkn"}> : () -> ()
    %cst_42 = arith.constant dense<0.000000e+00> : vector<4x1x16xf32>
    %114 = tpu.matmul %113, %107, %cst_42 {dimension_numbers = #tpu.dot_dimension_numbers<[2], [2], [1], [1], [0, 0, 0, 1, 1, 1], [0], [0]>} : vector<4x1x16xf32>, vector<4x16x16xf32>, vector<4x1x16xf32> -> vector<4x1x16xf32>
    "tpu.trace_stop"() : () -> ()
    %115 = vector.broadcast %112 : vector<4x16x1xf32> to vector<4x16x16xf32>
    %116 = vector.broadcast %114 : vector<4x1x16xf32> to vector<4x16x16xf32>
    %117 = arith.addf %115, %116 : vector<4x16x16xf32>
    %cst_43 = arith.constant 0.000000e+00 : f32
    %118 = vector.broadcast %cst_43 : f32 to vector<4x16x16xf32>
    %119 = arith.cmpf oge, %117, %118 : vector<4x16x16xf32>
    %cst_44 = arith.constant 2.000000e-01 : f32
    %120 = vector.broadcast %cst_44 : f32 to vector<4x16x16xf32>
    %121 = arith.mulf %120, %117 : vector<4x16x16xf32>
    %122 = arith.select %119, %117, %121 : vector<4x16x16xi1>, vector<4x16x16xf32>
    %123 = vector.shape_cast %101 : vector<16x16xf32> to vector<1x16x16xf32>
    %124 = vector.broadcast %123 : vector<1x16x16xf32> to vector<4x16x16xf32>
    %125 = arith.addf %122, %124 : vector<4x16x16xf32>
    %cst_45 = arith.constant dense<0xFF800000> : vector<4x16xf32>
    %126 = vector.multi_reduction <maximumf>, %125, %cst_45 [2] : vector<4x16x16xf32> to vector<4x16xf32>
    %127 = vector.shape_cast %126 : vector<4x16xf32> to vector<4x16x1xf32>
    %128 = vector.broadcast %127 : vector<4x16x1xf32> to vector<4x16x16xf32>
    %129 = arith.subf %125, %128 : vector<4x16x16xf32>
    %130 = math.exp %129 : vector<4x16x16xf32>
    %cst_46 = arith.constant dense<0.000000e+00> : vector<4x16xf32>
    %131 = vector.multi_reduction <add>, %130, %cst_46 [2] : vector<4x16x16xf32> to vector<4x16xf32>
    %132 = vector.shape_cast %131 : vector<4x16xf32> to vector<4x16x1xf32>
    %133 = tpu.reciprocal %132 {approx = true} : vector<4x16x1xf32> -> vector<4x16x1xf32>
    %134 = vector.broadcast %133 : vector<4x16x1xf32> to vector<4x16x16xf32>
    %135 = arith.mulf %130, %134 : vector<4x16x16xf32>
    "tpu.trace_start"() <{level = 10 : i32, message = "hij,hjf->hif"}> : () -> ()
    %cst_47 = arith.constant dense<0.000000e+00> : vector<4x16x16xf32>
    %136 = tpu.matmul %135, %107, %cst_47 {dimension_numbers = #tpu.dot_dimension_numbers<[2], [1], [1], [2], [0, 0, 0, 1, 1, 2], [0], [0]>} : vector<4x16x16xf32>, vector<4x16x16xf32>, vector<4x16x16xf32> -> vector<4x16x16xf32>
    "tpu.trace_stop"() : () -> ()
    %cst_48 = arith.constant dense<0.000000e+00> : vector<16x16xf32>
    %137 = vector.multi_reduction <add>, %136, %cst_48 [0] : vector<4x16x16xf32> to vector<16x16xf32>
    %cst_49 = arith.constant 2.500000e-01 : f32
    %138 = vector.broadcast %cst_49 : f32 to vector<16x16xf32>
    %139 = arith.mulf %137, %138 : vector<16x16xf32>
    %140 = vector.broadcast %99 : vector<1x16xf32> to vector<16x16xf32>
    %141 = arith.addf %139, %140 : vector<16x16xf32>
    %c392 = arith.constant 392 : index
    %c0_50 = arith.constant 0 : index
    %142 = vector.load %arg2[%c392, %c0_50] : memref<440x32xf32, #tpu.memory_space<vmem>>, vector<16x16xf32>
    %cst_51 = arith.constant dense<0.000000e+00> : vector<16x16xf32>
    %143 = tpu.matmul %141, %142, %cst_51 {dimension_numbers = #tpu.dot_dimension_numbers<[1], [0], [0], [1], [0, 0, 1, 1], [], []>} : vector<16x16xf32>, vector<16x16xf32>, vector<16x16xf32> -> vector<16x16xf32>
    %c408 = arith.constant 408 : index
    %c0_52 = arith.constant 0 : index
    %144 = vector.load %arg2[%c408, %c0_52] : memref<440x32xf32, #tpu.memory_space<vmem>>, vector<1x16xf32>
    %145 = vector.broadcast %144 : vector<1x16xf32> to vector<16x16xf32>
    %146 = arith.addf %143, %145 : vector<16x16xf32>
    %c416 = arith.constant 416 : index
    %c0_53 = arith.constant 0 : index
    %147 = vector.load %arg2[%c416, %c0_53] : memref<440x32xf32, #tpu.memory_space<vmem>>, vector<16x4xf32>
    %cst_54 = arith.constant dense<0.000000e+00> : vector<16x4xf32>
    %148 = tpu.matmul %146, %147, %cst_54 {dimension_numbers = #tpu.dot_dimension_numbers<[1], [0], [0], [1], [0, 0, 1, 1], [], []>} : vector<16x16xf32>, vector<16x4xf32>, vector<16x4xf32> -> vector<16x4xf32>
    %c432 = arith.constant 432 : index
    %c0_55 = arith.constant 0 : index
    %149 = vector.load %arg2[%c432, %c0_55] : memref<440x32xf32, #tpu.memory_space<vmem>>, vector<1x4xf32>
    %150 = vector.broadcast %149 : vector<1x4xf32> to vector<16x4xf32>
    %151 = arith.addf %148, %150 : vector<16x4xf32>
    %cst_56 = arith.constant dense<0xFF800000> : vector<16xf32>
    %152 = vector.multi_reduction <maximumf>, %151, %cst_56 [1] : vector<16x4xf32> to vector<16xf32>
    %153 = vector.shape_cast %152 : vector<16xf32> to vector<16x1xf32>
    %154 = vector.broadcast %153 : vector<16x1xf32> to vector<16x4xf32>
    %155 = arith.subf %151, %154 : vector<16x4xf32>
    %156 = math.exp %155 : vector<16x4xf32>
    %cst_57 = arith.constant dense<0.000000e+00> : vector<16xf32>
    %157 = vector.multi_reduction <add>, %156, %cst_57 [1] : vector<16x4xf32> to vector<16xf32>
    %158 = vector.shape_cast %157 : vector<16xf32> to vector<16x1xf32>
    %159 = vector.broadcast %158 : vector<16x1xf32> to vector<16x4xf32>
    %160 = arith.divf %156, %159 : vector<16x4xf32>
    %c3 = arith.constant 3 : index
    %c0_58 = arith.constant 0 : index
    %c0_59 = arith.constant 0 : index
    %161 = vector.load %arg1[%c3, %c0_58, %c0_59] : memref<4x16x16xf32, #tpu.memory_space<vmem>>, vector<1x16x16xf32>
    %162 = vector.shape_cast %161 : vector<1x16x16xf32> to vector<16x16xf32>
    %cst_60 = arith.constant dense<0.000000e+00> : vector<16xf32>
    %163 = vector.multi_reduction <add>, %162, %cst_60 [1] : vector<16x16xf32> to vector<16xf32>
    %164 = vector.shape_cast %163 : vector<16xf32> to vector<16x1xf32>
    %cst_61 = arith.constant dense<0.000000e+00> : vector<16x4xf32>
    %165 = tpu.matmul %162, %160, %cst_61 {dimension_numbers = #tpu.dot_dimension_numbers<[1], [0], [0], [1], [0, 0, 1, 1], [], []>} : vector<16x16xf32>, vector<16x4xf32>, vector<16x4xf32> -> vector<16x4xf32>
    %166 = vector.broadcast %164 : vector<16x1xf32> to vector<16x4xf32>
    %167 = arith.subf %166, %165 : vector<16x4xf32>
    %168 = vector.broadcast %164 : vector<16x1xf32> to vector<16x4xf32>
    %169 = arith.mulf %160, %168 : vector<16x4xf32>
    %cst_62 = arith.constant dense<0.000000e+00> : vector<4xf32>
    %170 = vector.multi_reduction <add>, %169, %cst_62 [0] : vector<16x4xf32> to vector<4xf32>
    %171 = vector.shape_cast %170 : vector<4xf32> to vector<1x4xf32>
    %172 = arith.mulf %160, %167 : vector<16x4xf32>
    %cst_63 = arith.constant 9.99999996E-13 : f32
    %173 = vector.broadcast %cst_63 : f32 to vector<1x4xf32>
    %174 = arith.addf %171, %173 : vector<1x4xf32>
    %175 = vector.broadcast %174 : vector<1x4xf32> to vector<16x4xf32>
    %176 = arith.divf %172, %175 : vector<16x4xf32>
    %177 = vector.shape_cast %176 : vector<16x4xf32> to vector<1x16x4xf32>
    %cst_64 = arith.constant dense<0.000000e+00> : vector<1xf32>
    %178 = vector.multi_reduction <add>, %177, %cst_64 [1, 2] : vector<1x16x4xf32> to vector<1xf32>
    %179 = vector.shape_cast %178 : vector<1xf32> to vector<1x1x1xf32>
    %180 = vector.extract %179[0, 0, 0] : f32 from vector<1x1x1xf32>
    %c0_65 = arith.constant 0 : index
    %c0_66 = arith.constant 0 : index
    %181 = memref.load %arg3[%c0_65, %c0_66] : memref<1x1xf32, #tpu.memory_space<smem>>
    memref.store %180, %arg3[%c0_65, %c0_66] : memref<1x1xf32, #tpu.memory_space<smem>>
    return
  }
}

</mosaic_0001>

<bundles_post_ra>
// kernel: tpu_custom_call.1
= control target key start
LH: loop header
LB: loop body
LE: loop exit
PB: predicated region body
PF: predicated region fallthrough
CT: control target
= control target key end

     0   :  { %v4270_v3 = vmov 0.0   ;;  %vm4271_vm0 = vmmov 0   ;;  %s4916_s0 = inlined_call_operand.vmem [shape: f32[16,32], index: 0, kind: input, shape index: {}]   ;;  %s4917_s1 = inlined_call_operand.vmem [shape: f32[4,16,16], index: 1, kind: input, shape index: {}]   ;;  %s4918_s2 = inlined_call_operand.vmem [shape: f32[440,32], index: 2, kind: input, shape index: {}]   ;;  %s4919_s3 = inlined_call_operand.hbm [shape: f32[1,1], index: 3, kind: output, shape index: {}]  }
   0x1   :  { %v20_v0 = vld [vmem:[%s4918_s2 + $0x10] sm:$0xff]  ;;  %v21_v1 = vld [vmem:[%s4918_s2 + $0x18] sm:$0xff]  ;;  %3871 = vmatprep.subr.bf16.mxu0 %v4270_v3  ;;  %3879 = vmatprep.subr.bf16.mxu1 %v4270_v3  ;;  %v18_v6 = vld [vmem:[%s4918_s2] sm:$0xff] }
   0x2   :  { %v24_v2 = vld [vmem:[%s4918_s2 + $0x30] sm:$0xff]  ;;  %v41_v4 = vpack.c.bf16 %v21_v1, %v20_v0  ;;  %v25_v5 = vld [vmem:[%s4918_s2 + $0x38] sm:$0xff]  ;;  %v19_v7 = vld [vmem:[%s4918_s2 + $0x8] sm:$0xff]  ;;  %3875 = vmatprep.mubr.msk.bf16.mxu0 %vm4271_vm0, %v4270_v3  ;;  %3883 = vmatprep.mubr.msk.bf16.mxu1 %vm4271_vm0, %v4270_v3 }
   0x3   :  { %v43_v8 = vpack.c.bf16 %v25_v5, %v24_v2  ;;  %v22_v9 = vld [vmem:[%s4918_s2 + $0x20] sm:$0xff]  ;;  %v23_v10 = vld [vmem:[%s4918_s2 + $0x28] sm:$0xff]  ;;  %v40_v11 = vpack.c.bf16 %v19_v7, %v18_v6  ;;  %v28_v15 = vld [vmem:[%s4918_s2 + $0x50] sm:$0xff] }
   0x4   :  { %3872 = vmatpush3.bf16.msra.mxu0 %v41_v4  ;;  %v16_v12 = vld [vmem:[%s4916_s0] sm:$0xff]  ;;  %v17_v13 = vld [vmem:[%s4916_s0 + $0x8] sm:$0xff]  ;;  %v42_v14 = vpack.c.bf16 %v23_v10, %v22_v9  ;;  %v29_v16 = vld [vmem:[%s4918_s2 + $0x58] sm:$0xff] }
   0x5   :  { %3880 = vmatpush3.bf16.msra.mxu1 %v43_v8  ;;  %3873 = vmatprep.subr.bf16.mxu0 %v4270_v3  ;;  %v32_v17 = vld [vmem:[%s4918_s2 + $0x70] sm:$0xff]  ;;  %v33_v18 = vld [vmem:[%s4918_s2 + $0x78] sm:$0xff]  ;;  %v39_v19 = vpack.c.bf16 %v17_v13, %v16_v12 }
   0x6   :  { %3881 = vmatprep.subr.bf16.mxu1 %v4270_v3 }
   0x7   :  { %8 = vsyncpa [#allocation3], 0  ;;  %vm48_vm1 = vcmask 261120   ;;  %v45_v20 = vpack.c.bf16 %v29_v16, %v28_v15  ;;  %v47_v21 = vpack.c.bf16 %v33_v18, %v32_v17  ;;  %v26_v22 = vld [vmem:[%s4918_s2 + $0x40] sm:$0xff]  ;;  %v27_v23 = vld [vmem:[%s4918_s2 + $0x48] sm:$0xff]  ;;  %v228_v30 = vlaneseq  ;;  %s4273_s29 = smov [#allocation2]  }
   0x8   :  { %3874 = vmatpush3.bf16.msra.mxu0 %v40_v11  ;;  %v30_v24 = vld [vmem:[%s4918_s2 + $0x60] sm:$0xff]  ;;  %v31_v25 = vld [vmem:[%s4918_s2 + $0x68] sm:$0xff]  ;;  %v44_v26 = vpack.c.bf16 %v27_v23, %v26_v22  ;;  %v4272_v28 = vmov 1966171168   ;;  %vm686_vm6 = vcmask 130048  }
   0x9   :  { %3882 = vmatpush3.bf16.msra.mxu1 %v42_v14  ;;  %3887 = vmatprep.subr.bf16.mxu0 %v4270_v3  ;;  %v46_v27 = vpack.c.bf16 %v31_v25, %v30_v24  ;;  %v226_v29 = vunpack.c.l.s4 %v4272_v28  ;;  %v229_v32 = vshrl.u32 %v228_v30, 7  ;;  %v3652_v33 = vld.sshfl [vmem:[%s4918_s2 + $0x88] sm:$0x33 pattern:$0x75316420] }
   0xa   :  { %3895 = vmatprep.subr.bf16.mxu1 %v4270_v3  ;;  %v224_v35 = vcombine.high %v3652_v33, %v3652_v33  ;;  %v3653_v47 = vld.sshfl [vmem:[%s4918_s2 + $0x80] sm:$0x33 pattern:$0x75316420] }
   0xb   :  { %3876 = vmatmul.mubr.msk.bf16.vlgmr.msra.gmra.mxu0 %vm48_vm1, %v39_v19  ;;  %v227_v31 = vunpack.c.0.s8 %v226_v29  ;;  %v4379_v36 = vsub.s32 0, %v229_v32  ;;  %v301_v55 = vcombine.high %v3653_v47, %v3653_v47 }
   0xc   :  { %3884 = vmatmul.mubr.msk.bf16.vlgmr.msra.gmra.mxu1 %vm48_vm1, %v39_v19  ;;  %3888 = vmatpush3.bf16.msra.mxu0 %v45_v20 }
   0xd   :  { %3896 = vmatpush3.bf16.msra.mxu1 %v47_v21  ;;  %3889 = vmatprep.subr.bf16.mxu0 %v4270_v3  ;;  %v4377_v34 = vsub.s32 %v227_v31, %v229_v32 }
   0xe   :  { %3897 = vmatprep.subr.bf16.mxu1 %v4270_v3  ;;  %3891 = vmatprep.mubr.msk.bf16.mxu0 %vm4271_vm0, %v4270_v3 }
   0xf   :  { %3899 = vmatprep.mubr.msk.bf16.mxu1 %vm4271_vm0, %v4270_v3  ;;  %v231_v37 = vrot.slane %v3652_v33, %v4377_v34  ;;  %v238_v38 = vrot.slane %v224_v35, %v4377_v34  ;;  %v308_v0 = vrot.slane %v3653_v47, %v4377_v34  ;;  %v315_v2 = vrot.slane %v301_v55, %v4377_v34 }
  0x10   :  { %3890 = vmatpush3.bf16.msra.mxu0 %v44_v26 }
  0x11   :  { %3898 = vmatpush3.bf16.msra.mxu1 %v46_v27  ;;  %3903 = vmatprep.subr.mxu0 %v4270_v3  ;;  %v244_v39 = vrot.slane %v231_v37, %v4379_v36  ;;  %v248_v40 = vrot.slane %v238_v38, %v4379_v36  ;;  %v239_v44 = vcombine.high %v231_v37, %v231_v37  ;;  %v38_v37 = vld [vmem:[%s4917_s1 + $0x8] sm:$0xff] }
  0x12   :  { %3910 = vmatprep.subr.mxu1 %v4270_v3  ;;  %v240_v48 = vcombine.high %v238_v38, %v238_v38  ;;  %v316_v17 = vcombine.high %v308_v0, %v308_v0  ;;  %v317_v18 = vcombine.high %v315_v2, %v315_v2  ;;  %v37_v38 = vld [vmem:[%s4917_s1] sm:$0xff] }
  0x13   :  { %3892 = vmatmul.mubr.msk.bf16.vlgmr.msra.gmra.mxu0 %vm48_vm1, %v39_v19  ;;  %v252_v56 = vrot.slane %v239_v44, %v4379_v36 }
  0x14   :  { %3900 = vmatmul.mubr.msk.bf16.vlgmr.msra.gmra.mxu1 %vm48_vm1, %v39_v19  ;;  %3907 = vmatprep.mubr.msk.f32.mxu0 %vm4271_vm0, %v4270_v3  ;;  %v256_v59 = vrot.slane %v240_v48, %v4379_v36 }
  0x15   :  { %3914 = vmatprep.mubr.msk.f32.mxu1 %vm4271_vm0, %v4270_v3 }
  0xcb   :  { %v4385_v41 = vpop.f32.mrf.mxu0 }
  0xcc   :  { %v4387_v42 = vpop.f32.mrf.mxu1  ;;  %v261_v43 = vmul.f32 %v244_v39, %v4385_v41 }
  0xcd   :  { %v3877_v45 = vpop.f32.mrf.mxu0  ;;  %v263_v46 = vmul.f32 %v248_v40, %v4387_v42 }
  0xce   :  { %v3885_v49 = vpop.f32.mrf.mxu1  ;;  %v269_v50 = vsel %vm48_vm1, %v261_v43, 0.0 }
  0xcf   :  { %v275_v51 = vsel %vm48_vm1, %v263_v46, 0.0  ;;  %270 = vadd.xlane.f32.xlu0 %v269_v50  ;;  %v89_v52 = vpop.f32.mrf.mxu0 }
  0xd0   :  { %276 = vadd.xlane.f32.xlu1 %v275_v51  ;;  %v130_v53 = vpop.f32.mrf.mxu1  ;;  %3904 = vmatpush3.xpose.msk.msra.mxu0 %vm48_vm1, %v89_v52  ;;  %v262_v54 = vmul.f32 %v244_v39, %v89_v52 }
  0xd1   :  { %3911 = vmatpush3.xpose.msk.msra.mxu1 %vm48_vm1, %v130_v53  ;;  %v3878_v57 = vpop.f32.mrf.mxu0  ;;  %v264_v58 = vmul.f32 %v248_v40, %v130_v53  ;;  %3905 = vmatprep.subr.mxu0 %v4270_v3 }
  0xd2   :  { %v3886_v60 = vpop.f32.mrf.mxu1  ;;  %3912 = vmatprep.subr.mxu1 %v4270_v3  ;;  %v272_v61 = vsel %vm48_vm1, %v262_v54, 0.0 }
  0xd3   :  { %v278_v62 = vsel %vm48_vm1, %v264_v58, 0.0  ;;  %273 = vadd.xlane.f32.xlu0 %v272_v61  ;;  %v4404_v63 = vpop.f32.mrf.mxu0 }
  0xd4   :  { %279 = vadd.xlane.f32.xlu1 %v278_v62  ;;  %v4407_v1 = vpop.f32.mrf.mxu1  ;;  %3906 = vmatpush3.xpose.msk.msra.mxu0 %vm48_vm1, %v4385_v41  ;;  %v265_v4 = vmul.f32 %v252_v56, %v4404_v63 }
  0xd5   :  { %3913 = vmatpush3.xpose.msk.msra.mxu1 %vm48_vm1, %v4387_v42  ;;  %v3893_v5 = vpop.f32.mrf.mxu0  ;;  %3917 = vmatprep.subr.mxu0 %v4270_v3  ;;  %v267_v6 = vmul.f32 %v256_v59, %v4407_v1 }
  0xd6   :  { %v3901_v7 = vpop.f32.mrf.mxu1  ;;  %3924 = vmatprep.subr.mxu1 %v4270_v3  ;;  %v281_v8 = vsel %vm48_vm1, %v265_v4, 0.0 }
  0xd7   :  { %3908 = vmatmul.mubr.msk.f32.vlgmr.msra.gmra.mxu0 %vm48_vm1, %v308_v0  ;;  %282 = vadd.xlane.f32.xlu0 %v281_v8  ;;  %v4420_v9 = vpop.f32.mrf.mxu0  ;;  %v287_v11 = vsel %vm48_vm1, %v267_v6, 0.0 }
  0xd8   :  { %v4422_v10 = vpop.f32.mrf.mxu1  ;;  %3915 = vmatmul.mubr.msk.f32.vlgmr.msra.gmra.mxu1 %vm48_vm1, %v315_v2  ;;  %3918 = vmatpush3.xpose.msk.msra.mxu0 %vm48_vm1, %v4420_v9  ;;  %v266_v12 = vmul.f32 %v252_v56, %v4420_v9 }
  0xd9   :  { %3925 = vmatpush3.xpose.msk.msra.mxu1 %vm48_vm1, %v4422_v10  ;;  %v3894_v13 = vpop.f32.mrf.mxu0  ;;  %3919 = vmatprep.subr.mxu0 %v4270_v3  ;;  %v268_v16 = vmul.f32 %v256_v59, %v4422_v10 }
  0xda   :  { %v3902_v14 = vpop.f32.mrf.mxu1  ;;  %3926 = vmatprep.subr.mxu1 %v4270_v3  ;;  %v284_v15 = vsel %vm48_vm1, %v266_v12, 0.0  ;;  %3921 = vmatprep.mubr.msk.f32.mxu0 %vm4271_vm0, %v4270_v3 }
  0xdb   :  { %288 = vadd.xlane.f32.xlu0 %v287_v11  ;;  %285 = vadd.xlane.f32.xlu1 %v284_v15  ;;  %v290_v19 = vsel %vm48_vm1, %v268_v16, 0.0 }
  0xdc   :  { %3920 = vmatpush3.xpose.msk.msra.mxu0 %vm48_vm1, %v4404_v63  ;;  %3928 = vmatprep.mubr.msk.f32.mxu1 %vm4271_vm0, %v4270_v3 }
  0xdd   :  { %3927 = vmatpush3.xpose.msk.msra.mxu1 %vm48_vm1, %v4407_v1  ;;  %3931 = vmatprep.subr.mxu0 %v89_v52 }
  0xde   :  { %3938 = vmatprep.subr.mxu1 %v130_v53 }
  0xdf   :  { %3922 = vmatmul.mubr.msk.f32.vlgmr.msra.gmra.mxu0 %vm48_vm1, %v316_v17  ;;  %291 = vadd.xlane.f32.xlu1 %v290_v19 }
  0xe0   :  { %3929 = vmatmul.mubr.msk.f32.vlgmr.msra.gmra.mxu1 %vm48_vm1, %v317_v18  ;;  %3932 = vmatpush3.msra.mxu0 %v89_v52 }
  0xe1   :  { %3939 = vmatpush3.msra.mxu1 %v130_v53  ;;  %3933 = vmatprep.subr.mxu0 %v4385_v41 }
  0xe2   :  { %3940 = vmatprep.subr.mxu1 %v4387_v42  ;;  %3934 = vmatpush3.msra.mxu0 %v4385_v41 }
  0xe3   :  { %3941 = vmatpush3.msra.mxu1 %v4387_v42  ;;  %3945 = vmatprep.subr.mxu0 %v4420_v9 }
  0xe4   :  { %3952 = vmatprep.subr.mxu1 %v4422_v10 }
 0x158   :  { %v271_v20 = vpop.xlane.xlu0 %270 }
 0x159   :  { %v277_v21 = vpop.xlane.xlu1 %276 }
 0x15c   :  { %v274_v22 = vpop.xlane.xlu0 %273 }
 0x15d   :  { %v280_v24 = vpop.xlane.xlu1 %279 }
 0x160   :  { %v283_v32 = vpop.xlane.xlu0 %282 }
 0x164   :  { %v286_v39 = vpop.xlane.xlu1 %285  ;;  %v289_v55 = vpop.xlane.xlu0 %288 }
 0x168   :  { %v292_v60 = vpop.xlane.xlu1 %291 }
 0x197   :  { %v392_v23 = vpop.f32.mrf.mxu0 }
 0x198   :  { %v633_v25 = vrot.slane %v392_v23, %v4379_v36  ;;  %v470_v26 = vpop.f32.mrf.mxu1 }
 0x199   :  { %v637_v27 = vrot.slane %v470_v26, %v4379_v36  ;;  %v3909_v28 = vpop.f32.mrf.mxu0 }
 0x19a   :  { %v646_v29 = vadd.f32 %v633_v25, %v271_v20  ;;  %v647_v30 = vadd.f32 %v633_v25, %v274_v22  ;;  %v3916_v31 = vpop.f32.mrf.mxu1 }
 0x19b   :  { %v648_v33 = vadd.f32 %v637_v27, %v277_v21  ;;  %v649_v35 = vadd.f32 %v637_v27, %v280_v24 }
 0x19c   :  { %v662_v40 = vmul.f32 0.2, %v646_v29  ;;  %v663_v41 = vmul.f32 0.2, %v647_v30  ;;  %vm655_vm2 = vcmp.ge.f32.partialorder %v647_v30, 0.0  ;;  %vm654_vm3 = vcmp.ge.f32.partialorder %v646_v29, 0.0 }
 0x19d   :  { %v664_v42 = vmul.f32 0.2, %v648_v33  ;;  %v665_v43 = vmul.f32 0.2, %v649_v35  ;;  %vm657_vm4 = vcmp.ge.f32.partialorder %v649_v35, 0.0  ;;  %vm656_vm5 = vcmp.ge.f32.partialorder %v648_v33, 0.0 }
 0x19e   :  { %v671_v44 = vsel %vm655_vm2, %v647_v30, %v663_v41  ;;  %v670_v45 = vsel %vm654_vm3, %v646_v29, %v662_v40 }
 0x19f   :  { %v548_v46 = vpop.f32.mrf.mxu0  ;;  %v679_v47 = vadd.f32 %v671_v44, %v38_v37  ;;  %v678_v48 = vadd.f32 %v670_v45, %v37_v38  ;;  %v673_v49 = vsel %vm657_vm4, %v649_v35, %v665_v43  ;;  %v672_v50 = vsel %vm656_vm5, %v648_v33, %v664_v42 }
 0x1a0   :  { %v641_v51 = vrot.slane %v548_v46, %v4379_v36  ;;  %v626_v52 = vpop.f32.mrf.mxu1  ;;  %v681_v53 = vadd.f32 %v673_v49, %v38_v37  ;;  %v680_v54 = vadd.f32 %v672_v50, %v37_v38 }
 0x1a1   :  { %v645_v56 = vrot.slane %v626_v52, %v4379_v36  ;;  %v3923_v57 = vpop.f32.mrf.mxu0  ;;  %v690_v58 = vsel %vm686_vm6, %v679_v47, -inf  ;;  %v687_v59 = vsel %vm686_vm6, %v678_v48, -inf }
 0x1a2   :  { %v650_v61 = vadd.f32 %v641_v51, %v283_v32  ;;  %v651_v62 = vadd.f32 %v641_v51, %v286_v39  ;;  %691 = vmax.xlane.f32.xlu1 %v690_v58  ;;  %688 = vmax.xlane.f32.xlu0 %v687_v59  ;;  %v3930_v0 = vpop.f32.mrf.mxu1  ;;  %v696_v5 = vsel %vm686_vm6, %v681_v53, -inf  ;;  %v693_v6 = vsel %vm686_vm6, %v680_v54, -inf }
 0x1a3   :  { %v652_v2 = vadd.f32 %v645_v56, %v289_v55  ;;  %v653_v4 = vadd.f32 %v645_v56, %v292_v60 }
 0x1a4   :  { %v666_v7 = vmul.f32 0.2, %v650_v61  ;;  %v667_v8 = vmul.f32 0.2, %v651_v62  ;;  %vm659_vm7 = vcmp.ge.f32.partialorder %v651_v62, 0.0  ;;  %vm658_vm8 = vcmp.ge.f32.partialorder %v650_v61, 0.0 }
 0x1a5   :  { %v668_v11 = vmul.f32 0.2, %v652_v2  ;;  %v669_v12 = vmul.f32 0.2, %v653_v4  ;;  %vm661_vm9 = vcmp.ge.f32.partialorder %v653_v4, 0.0  ;;  %vm660_vm10 = vcmp.ge.f32.partialorder %v652_v2, 0.0 }
 0x1a6   :  { %697 = vmax.xlane.f32.xlu1 %v696_v5  ;;  %694 = vmax.xlane.f32.xlu0 %v693_v6  ;;  %v675_v13 = vsel %vm659_vm7, %v651_v62, %v667_v8  ;;  %v674_v14 = vsel %vm658_vm8, %v650_v61, %v666_v7 }
 0x1a7   :  { %v683_v15 = vadd.f32 %v675_v13, %v38_v37  ;;  %v682_v16 = vadd.f32 %v674_v14, %v37_v38  ;;  %v677_v17 = vsel %vm661_vm9, %v653_v4, %v669_v12  ;;  %v676_v18 = vsel %vm660_vm10, %v652_v2, %v668_v11 }
 0x1a8   :  { %v685_v21 = vadd.f32 %v677_v17, %v38_v37  ;;  %v684_v22 = vadd.f32 %v676_v18, %v37_v38 }
 0x1a9   :  { %v702_v19 = vsel %vm686_vm6, %v683_v15, -inf  ;;  %v699_v20 = vsel %vm686_vm6, %v682_v16, -inf }
 0x1aa   :  { %703 = vmax.xlane.f32.xlu1 %v702_v19  ;;  %700 = vmax.xlane.f32.xlu0 %v699_v20  ;;  %v708_v23 = vsel %vm686_vm6, %v685_v21, -inf  ;;  %v705_v24 = vsel %vm686_vm6, %v684_v22, -inf }
 0x1ae   :  { %709 = vmax.xlane.f32.xlu1 %v708_v23  ;;  %706 = vmax.xlane.f32.xlu0 %v705_v24 }
 0x22b   :  { %v692_v25 = vpop.xlane.xlu1 %691  ;;  %v689_v26 = vpop.xlane.xlu0 %688 }
 0x22c   :  { %v712_v27 = vsub.f32 %v679_v47, %v692_v25  ;;  %v711_v28 = vsub.f32 %v678_v48, %v689_v26 }
 0x22e   :  { %v721_v29 = vmul.f32 1.442695, %v712_v27  ;;  %v719_v30 = vmul.f32 1.442695, %v711_v28 }
 0x22f   :  { %v698_v31 = vpop.xlane.xlu1 %697  ;;  %v695_v32 = vpop.xlane.xlu0 %694 }
 0x230   :  { %4154 = vpow2.f32 %v721_v29  ;;  %v714_v33 = vsub.f32 %v681_v53, %v698_v31  ;;  %v713_v35 = vsub.f32 %v680_v54, %v695_v32  ;;  %v1128_v32 = vld [vmem:[%s4918_s2 + $0xd0] sm:$0xff] }
 0x231   :  { %4156 = vpow2.f32 %v719_v30  ;;  %v1127_v30 = vld [vmem:[%s4918_s2 + $0xc8] sm:$0xff] }
 0x232   :  { %v725_v37 = vmul.f32 1.442695, %v714_v33  ;;  %v723_v38 = vmul.f32 1.442695, %v713_v35  ;;  %v1147_v33 = vpack.c.bf16 %v1128_v32, %v1127_v30  ;;  %v1121_v35 = vld [vmem:[%s4918_s2 + $0x98] sm:$0xff] }
 0x233   :  { %v704_v39 = vpop.xlane.xlu1 %703  ;;  %v701_v40 = vpop.xlane.xlu0 %700 }
 0x234   :  { %4158 = vpow2.f32 %v725_v37  ;;  %v716_v41 = vsub.f32 %v683_v15, %v704_v39  ;;  %v715_v42 = vsub.f32 %v682_v16, %v701_v40  ;;  %v1122_v37 = vld [vmem:[%s4918_s2 + $0xa0] sm:$0xff] }
 0x235   :  { %4160 = vpow2.f32 %v723_v38  ;;  %v1125_v38 = vld [vmem:[%s4918_s2 + $0xb8] sm:$0xff]  ;;  %v1144_v39 = vpack.c.bf16 %v1122_v37, %v1121_v35  ;;  %v1126_v40 = vld [vmem:[%s4918_s2 + $0xc0] sm:$0xff] }
 0x236   :  { %v729_v43 = vmul.f32 1.442695, %v716_v41  ;;  %v727_v44 = vmul.f32 1.442695, %v715_v42  ;;  %v1146_v41 = vpack.c.bf16 %v1126_v40, %v1125_v38 }
 0x237   :  { %v710_v45 = vpop.xlane.xlu1 %709  ;;  %v707_v46 = vpop.xlane.xlu0 %706 }
 0x238   :  { %4162 = vpow2.f32 %v729_v43  ;;  %v718_v47 = vsub.f32 %v685_v21, %v710_v45  ;;  %v717_v48 = vsub.f32 %v684_v22, %v707_v46 }
 0x239   :  { %4164 = vpow2.f32 %v727_v44 }
 0x23a   :  { %v733_v49 = vmul.f32 1.442695, %v718_v47  ;;  %v731_v50 = vmul.f32 1.442695, %v717_v48 }
 0x23c   :  { %4166 = vpow2.f32 %v733_v49 }
 0x23d   :  { %v4155_v51 = vpop.eup %4154  ;;  %4168 = vpow2.f32 %v731_v50 }
 0x23e   :  { %v4157_v52 = vpop.eup %4156  ;;  %v738_v53 = vsel %vm686_vm6, %v4155_v51, 0.0 }
 0x23f   :  { %739 = vadd.xlane.f32.xlu1 %v738_v53  ;;  %v735_v54 = vsel %vm686_vm6, %v4157_v52, 0.0 }
 0x240   :  { %736 = vadd.xlane.f32.xlu0 %v735_v54 }
 0x241   :  { %v4159_v55 = vpop.eup %4158 }
 0x242   :  { %v4161_v56 = vpop.eup %4160  ;;  %v744_v57 = vsel %vm686_vm6, %v4159_v55, 0.0 }
 0x243   :  { %745 = vadd.xlane.f32.xlu1 %v744_v57  ;;  %v741_v58 = vsel %vm686_vm6, %v4161_v56, 0.0 }
 0x244   :  { %742 = vadd.xlane.f32.xlu0 %v741_v58 }
 0x245   :  { %v4163_v59 = vpop.eup %4162 }
 0x246   :  { %v4165_v60 = vpop.eup %4164  ;;  %v750_v61 = vsel %vm686_vm6, %v4163_v59, 0.0 }
 0x247   :  { %751 = vadd.xlane.f32.xlu1 %v750_v61  ;;  %v747_v62 = vsel %vm686_vm6, %v4165_v60, 0.0 }
 0x248   :  { %748 = vadd.xlane.f32.xlu0 %v747_v62 }
 0x249   :  { %v4167_v0 = vpop.eup %4166 }
 0x24a   :  { %v4169_v2 = vpop.eup %4168  ;;  %v756_v4 = vsel %vm686_vm6, %v4167_v0, 0.0 }
 0x24b   :  { %757 = vadd.xlane.f32.xlu1 %v756_v4  ;;  %v753_v5 = vsel %vm686_vm6, %v4169_v2, 0.0  ;;  %v3674_v4 = vld [vmem:[%s4918_s2 + $0x90] ss:$0 sm:$0xff] }
 0x24c   :  { %754 = vadd.xlane.f32.xlu0 %v753_v5  ;;  %v1131_v5 = vld [vmem:[%s4918_s2 + $0xe8] sm:$0xff] }
 0x2c8   :  { %v740_v6 = vpop.xlane.xlu1 %739 }
 0x2c9   :  { %4170 = vrcp.f32 %v740_v6  ;;  %v737_v7 = vpop.xlane.xlu0 %736 }
 0x2ca   :  { %4172 = vrcp.f32 %v737_v7  ;;  %v1132_v7 = vld [vmem:[%s4918_s2 + $0xf0] sm:$0xff] }
 0x2cc   :  { %v746_v8 = vpop.xlane.xlu1 %745 }
 0x2cd   :  { %4174 = vrcp.f32 %v746_v8  ;;  %v743_v11 = vpop.xlane.xlu0 %742  ;;  %v1135_v8 = vld [vmem:[%s4918_s2 + $0x108] sm:$0xff] }
 0x2ce   :  { %4176 = vrcp.f32 %v743_v11  ;;  %v1136_v11 = vld [vmem:[%s4918_s2 + $0x110] sm:$0xff] }
 0x2d0   :  { %v752_v12 = vpop.xlane.xlu1 %751 }
 0x2d1   :  { %4178 = vrcp.f32 %v752_v12  ;;  %v749_v13 = vpop.xlane.xlu0 %748 }
 0x2d2   :  { %4180 = vrcp.f32 %v749_v13 }
 0x2d4   :  { %v758_v14 = vpop.xlane.xlu1 %757 }
 0x2d5   :  { %4182 = vrcp.f32 %v758_v14  ;;  %v755_v15 = vpop.xlane.xlu0 %754  ;;  %v1149_v14 = vpack.c.bf16 %v1132_v7, %v1131_v5 }
 0x2d6   :  { %v4171_v16 = vpop.eup %4170  ;;  %4184 = vrcp.f32 %v755_v15  ;;  %v1151_v15 = vpack.c.bf16 %v1136_v11, %v1135_v8 }
 0x2d7   :  { %v4173_v17 = vpop.eup %4172  ;;  %v768_v18 = vmul.f32 %v4171_v16, %v4155_v51  ;;  %v1129_v16 = vld [vmem:[%s4918_s2 + $0xd8] sm:$0xff] }
 0x2d8   :  { %v767_v19 = vmul.f32 %v4173_v17, %v4157_v52 }
 0x2da   :  { %v4175_v20 = vpop.eup %4174  ;;  %3935 = vmatprep.mubr.msk.f32.mxu0 %vm686_vm6, %v767_v19  ;;  %v1133_v19 = vld [vmem:[%s4918_s2 + $0xf8] sm:$0xff] }
 0x2db   :  { %v4177_v21 = vpop.eup %4176  ;;  %3936 = vmatmul.mubr.msk.f32.vlgmr.msra.gmra.mxu0 %vm686_vm6, %v768_v18  ;;  %v770_v22 = vmul.f32 %v4175_v20, %v4159_v55  ;;  %v1130_v18 = vld [vmem:[%s4918_s2 + $0xe0] sm:$0xff] }
 0x2dc   :  { %3946 = vmatpush3.msra.mxu0 %v4420_v9  ;;  %v769_v23 = vmul.f32 %v4177_v21, %v4161_v56  ;;  %v1134_v20 = vld [vmem:[%s4918_s2 + $0x100] sm:$0xff]  ;;  %v1148_v21 = vpack.c.bf16 %v1130_v18, %v1129_v16 }
 0x2dd   :  { %3947 = vmatprep.subr.mxu0 %v4404_v63 }
 0x2de   :  { %v4179_v24 = vpop.eup %4178  ;;  %3948 = vmatpush3.msra.mxu0 %v4404_v63  ;;  %3942 = vmatprep.mubr.msk.f32.mxu1 %vm686_vm6, %v769_v23  ;;  %v3681_v23 = vld.sshfl [vmem:[%s4918_s2 + $0x120] sm:$0x33 pattern:$0x75316420] }
 0x2df   :  { %v4181_v25 = vpop.eup %4180  ;;  %3943 = vmatmul.mubr.msk.f32.vlgmr.msra.gmra.mxu1 %vm686_vm6, %v770_v22  ;;  %v772_v26 = vmul.f32 %v4179_v24, %v4163_v59  ;;  %3959 = vmatprep.subr.bf16.mxu0 %v4270_v3  ;;  %v1150_v22 = vpack.c.bf16 %v1134_v20, %v1133_v19  ;;  %v1327_v24 = vcombine.high %v3681_v23, %v3681_v23 }
 0x2e0   :  { %3953 = vmatpush3.msra.mxu1 %v4422_v10  ;;  %v771_v27 = vmul.f32 %v4181_v25, %v4165_v60  ;;  %v1124_v10 = vld [vmem:[%s4918_s2 + $0xb0] sm:$0xff]  ;;  %v1334_v25 = vrot.slane %v3681_v23, %v4377_v34 }
 0x2e1   :  { %3954 = vmatprep.subr.mxu1 %v4407_v1 }
 0x2e2   :  { %v4183_v9 = vpop.eup %4182  ;;  %3955 = vmatpush3.msra.mxu1 %v4407_v1  ;;  %3949 = vmatprep.mubr.msk.f32.mxu0 %vm686_vm6, %v771_v27  ;;  %v1123_v1 = vld [vmem:[%s4918_s2 + $0xa8] sm:$0xff]  ;;  %v1347_v27 = vrot.slane %v1334_v25, %v4379_v36 }
 0x2e3   :  { %v4185_v28 = vpop.eup %4184  ;;  %3950 = vmatmul.mubr.msk.f32.vlgmr.msra.gmra.mxu0 %vm686_vm6, %v772_v26  ;;  %v774_v63 = vmul.f32 %v4183_v9, %v4167_v0  ;;  %3967 = vmatprep.subr.bf16.mxu1 %v4270_v3  ;;  %v1145_v31 = vpack.c.bf16 %v1124_v10, %v1123_v1  ;;  %v1341_v26 = vrot.slane %v1327_v24, %v4377_v34  ;;  %v3682_v1 = vld.sshfl [vmem:[%s4918_s2 + $0x118] sm:$0x33 pattern:$0x75316420] }
 0x2e4   :  { %v773_v29 = vmul.f32 %v4185_v28, %v4169_v2  ;;  %3963 = vmatprep.mubr.msk.bf16.mxu0 %vm4271_vm0, %v4270_v3  ;;  %v1342_v10 = vcombine.high %v1334_v25, %v1334_v25 }
 0x2e5   :  { %3960 = vmatpush3.bf16.msra.mxu0 %v1145_v31  ;;  %v1351_v9 = vrot.slane %v1341_v26, %v4379_v36  ;;  %v1343_v35 = vcombine.high %v1341_v26, %v1341_v26  ;;  %v3676_v26 = vld [vmem:[%s4917_s1 + $0x18] sm:$0xff] }
 0x2e6   :  { %3956 = vmatprep.mubr.msk.f32.mxu1 %vm686_vm6, %v773_v29  ;;  %3961 = vmatprep.subr.bf16.mxu0 %v4270_v3 }
 0x2e7   :  { %3957 = vmatmul.mubr.msk.f32.vlgmr.msra.gmra.mxu1 %vm686_vm6, %v774_v63 }
 0x2e8   :  { %3971 = vmatprep.mubr.msk.bf16.mxu1 %vm4271_vm0, %v4270_v3  ;;  %3968 = vmatpush3.bf16.msra.mxu1 %v1147_v33 }
 0x2e9   :  { %3969 = vmatprep.subr.bf16.mxu1 %v4270_v3  ;;  %3962 = vmatpush3.bf16.msra.mxu0 %v1144_v39  ;;  %v1404_v39 = vcombine.high %v3682_v1, %v3682_v1 }
 0x2ea   :  { %3975 = vmatprep.subr.bf16.mxu0 %v4270_v3 }
 0x2ec   :  { %3970 = vmatpush3.bf16.msra.mxu1 %v1146_v41  ;;  %v1355_v41 = vrot.slane %v1342_v10, %v4379_v36 }
 0x2ed   :  { %3983 = vmatprep.subr.bf16.mxu1 %v4270_v3 }
 0x39b   :  { %v3937_v42 = vpop.f32.mrf.mxu0 }
 0x39c   :  { %v1106_v48 = vsel %vm48_vm1, %v3937_v42, 0.0 }
 0x39d   :  { %v847_v44 = vpop.f32.mrf.mxu0 }
 0x39e   :  { %v1099_v53 = vsel %vm48_vm1, %v847_v44, 0.0 }
 0x39f   :  { %v3944_v43 = vpop.f32.mrf.mxu1 }
 0x3a0   :  { %v1107_v46 = vsel %vm48_vm1, %v3944_v43, 0.0 }
 0x3a1   :  { %v928_v45 = vpop.f32.mrf.mxu1  ;;  %v1108_v51 = vadd.f32 %v1107_v46, %v1106_v48  ;;  %v1359_v46 = vrot.slane %v1343_v35, %v4379_v36 }
 0x3a2   :  { %v1100_v49 = vsel %vm48_vm1, %v928_v45, 0.0 }
 0x3a3   :  { %v3951_v47 = vpop.f32.mrf.mxu0  ;;  %v1101_v55 = vadd.f32 %v1100_v49, %v1099_v53  ;;  %v1411_v49 = vrot.slane %v3682_v1, %v4377_v34 }
 0x3a4   :  { %v1109_v50 = vsel %vm48_vm1, %v3951_v47, 0.0 }
 0x3a5   :  { %v1009_v52 = vpop.f32.mrf.mxu0  ;;  %v1110_v56 = vadd.f32 %v1109_v50, %v1108_v51  ;;  %v1418_v50 = vrot.slane %v1404_v39, %v4377_v34 }
 0x3a6   :  { %v1102_v54 = vsel %vm48_vm1, %v1009_v52, 0.0 }
 0x3a7   :  { %v3958_v57 = vpop.f32.mrf.mxu1  ;;  %v1103_v59 = vadd.f32 %v1102_v54, %v1101_v55  ;;  %v1420_v5 = vcombine.high %v1418_v50, %v1418_v50 }
 0x3a8   :  { %v1111_v58 = vsel %vm48_vm1, %v3958_v57, 0.0 }
 0x3a9   :  { %v1112_v60 = vadd.f32 %v1111_v58, %v1110_v56  ;;  %v1090_v61 = vpop.f32.mrf.mxu1 }
 0x3aa   :  { %v1104_v62 = vsel %vm48_vm1, %v1090_v61, 0.0 }
 0x3ab   :  { %v1114_v0 = vmul.f32 0.25, %v1112_v60  ;;  %v1105_v2 = vadd.f32 %v1104_v62, %v1103_v59 }
 0x3ad   :  { %v1113_v6 = vmul.f32 0.25, %v1105_v2  ;;  %v1120_v12 = vadd.f32 %v3674_v4, %v1114_v0 }
 0x3af   :  { %v1119_v13 = vadd.f32 %v3674_v4, %v1113_v6  ;;  %v1419_v4 = vcombine.high %v1411_v49, %v1411_v49 }
 0x3b1   :  { %v1143_v17 = vpack.c.bf16 %v1120_v12, %v1119_v13 }
 0x3b3   :  { %3964 = vmatmul.mubr.msk.bf16.vlgmr.msra.gmra.mxu0 %vm48_vm1, %v1143_v17  ;;  %3972 = vmatmul.mubr.msk.bf16.vlgmr.msra.gmra.mxu1 %vm48_vm1, %v1143_v17 }
 0x3b4   :  { %3976 = vmatpush3.bf16.msra.mxu0 %v1149_v14  ;;  %3984 = vmatpush3.bf16.msra.mxu1 %v1151_v15 }
 0x3b5   :  { %3977 = vmatprep.subr.bf16.mxu0 %v4270_v3  ;;  %3985 = vmatprep.subr.bf16.mxu1 %v4270_v3 }
 0x3b6   :  { %3979 = vmatprep.mubr.msk.bf16.mxu0 %vm4271_vm0, %v4270_v3  ;;  %3987 = vmatprep.mubr.msk.bf16.mxu1 %vm4271_vm0, %v4270_v3 }
 0x3b8   :  { %3978 = vmatpush3.bf16.msra.mxu0 %v1148_v21  ;;  %3986 = vmatpush3.bf16.msra.mxu1 %v1150_v22 }
 0x3b9   :  { %3991 = vmatprep.subr.mxu0 %v4270_v3  ;;  %3998 = vmatprep.subr.mxu1 %v4270_v3 }
 0x3bb   :  { %3980 = vmatmul.mubr.msk.bf16.vlgmr.msra.gmra.mxu0 %vm48_vm1, %v1143_v17  ;;  %3988 = vmatmul.mubr.msk.bf16.vlgmr.msra.gmra.mxu1 %vm48_vm1, %v1143_v17 }
 0x3bc   :  { %3995 = vmatprep.mubr.msk.f32.mxu0 %vm4271_vm0, %v4270_v3  ;;  %4002 = vmatprep.mubr.msk.f32.mxu1 %vm4271_vm0, %v4270_v3 }
 0x473   :  { %v4584_v28 = vpop.f32.mrf.mxu0  ;;  %v4586_v63 = vpop.f32.mrf.mxu1 }
 0x474   :  { %v1364_v29 = vmul.f32 %v1347_v27, %v4584_v28  ;;  %v1366_v33 = vmul.f32 %v1351_v9, %v4586_v63 }
 0x475   :  { %v3965_v30 = vpop.f32.mrf.mxu0  ;;  %v3973_v31 = vpop.f32.mrf.mxu1 }
 0x476   :  { %v1372_v32 = vsel %vm686_vm6, %v1364_v29, 0.0  ;;  %v1378_v44 = vsel %vm686_vm6, %v1366_v33, 0.0 }
 0x477   :  { %v1233_v37 = vpop.f32.mrf.mxu1  ;;  %1373 = vadd.xlane.f32.xlu0 %v1372_v32  ;;  %v1192_v38 = vpop.f32.mrf.mxu0 }
 0x478   :  { %3992 = vmatpush3.xpose.msk.msra.mxu0 %vm686_vm6, %v1192_v38  ;;  %3999 = vmatpush3.xpose.msk.msra.mxu1 %vm686_vm6, %v1233_v37  ;;  %v1365_v40 = vmul.f32 %v1347_v27, %v1192_v38  ;;  %v1367_v51 = vmul.f32 %v1351_v9, %v1233_v37  ;;  %v3675_v27 = vld [vmem:[%s4917_s1 + $0x10] sm:$0xff] }
 0x479   :  { %v3966_v42 = vpop.f32.mrf.mxu0  ;;  %v3974_v43 = vpop.f32.mrf.mxu1  ;;  %4000 = vmatprep.subr.mxu1 %v4270_v3  ;;  %3993 = vmatprep.subr.mxu0 %v4270_v3 }
 0x47a   :  { %v1375_v45 = vsel %vm686_vm6, %v1365_v40, 0.0  ;;  %v1381_v57 = vsel %vm686_vm6, %v1367_v51, 0.0 }
 0x47b   :  { %v4602_v47 = vpop.f32.mrf.mxu1  ;;  %1379 = vadd.xlane.f32.xlu0 %v1378_v44  ;;  %1376 = vadd.xlane.f32.xlu1 %v1375_v45  ;;  %v4604_v48 = vpop.f32.mrf.mxu0 }
 0x47c   :  { %3994 = vmatpush3.xpose.msk.msra.mxu0 %vm686_vm6, %v4584_v28  ;;  %4001 = vmatpush3.xpose.msk.msra.mxu1 %vm686_vm6, %v4586_v63  ;;  %v1368_v52 = vmul.f32 %v1355_v41, %v4604_v48  ;;  %v1370_v59 = vmul.f32 %v1359_v46, %v4602_v47 }
 0x47d   :  { %v3981_v53 = vpop.f32.mrf.mxu0  ;;  %v3989_v54 = vpop.f32.mrf.mxu1  ;;  %4005 = vmatprep.subr.mxu0 %v4270_v3  ;;  %4012 = vmatprep.subr.mxu1 %v4270_v3 }
 0x47e   :  { %v1384_v55 = vsel %vm686_vm6, %v1368_v52, 0.0  ;;  %v1390_v2 = vsel %vm686_vm6, %v1370_v59, 0.0 }
 0x47f   :  { %v4616_v56 = vpop.f32.mrf.mxu1  ;;  %3996 = vmatmul.mubr.msk.f32.vlgmr.msra.gmra.mxu0 %vm686_vm6, %v1411_v49  ;;  %4003 = vmatmul.mubr.msk.f32.vlgmr.msra.gmra.mxu1 %vm686_vm6, %v1418_v50  ;;  %v4621_v58 = vpop.f32.mrf.mxu0 }
 0x480   :  { %1382 = vadd.xlane.f32.xlu1 %v1381_v57  ;;  %1385 = vadd.xlane.f32.xlu0 %v1384_v55  ;;  %v1369_v60 = vmul.f32 %v1355_v41, %v4621_v58  ;;  %v1371_v6 = vmul.f32 %v1359_v46, %v4616_v56 }
 0x481   :  { %4006 = vmatpush3.xpose.msk.msra.mxu0 %vm686_vm6, %v4621_v58  ;;  %4013 = vmatpush3.xpose.msk.msra.mxu1 %vm686_vm6, %v4616_v56  ;;  %v3982_v61 = vpop.f32.mrf.mxu0  ;;  %v3990_v62 = vpop.f32.mrf.mxu1 }
 0x482   :  { %4014 = vmatprep.subr.mxu1 %v4270_v3  ;;  %4007 = vmatprep.subr.mxu0 %v4270_v3  ;;  %v1387_v0 = vsel %vm686_vm6, %v1369_v60, 0.0  ;;  %v1393_v7 = vsel %vm686_vm6, %v1371_v6, 0.0 }
 0x483   :  { %4009 = vmatprep.mubr.msk.f32.mxu0 %vm4271_vm0, %v4270_v3  ;;  %4016 = vmatprep.mubr.msk.f32.mxu1 %vm4271_vm0, %v4270_v3 }
 0x484   :  { %1391 = vadd.xlane.f32.xlu0 %v1390_v2  ;;  %1388 = vadd.xlane.f32.xlu1 %v1387_v0 }
 0x485   :  { %4008 = vmatpush3.xpose.msk.msra.mxu0 %vm686_vm6, %v4604_v48  ;;  %4015 = vmatpush3.xpose.msk.msra.mxu1 %vm686_vm6, %v4602_v47 }
 0x486   :  { %4019 = vmatprep.subr.mxu0 %v1192_v38  ;;  %4026 = vmatprep.subr.mxu1 %v1233_v37 }
 0x488   :  { %4010 = vmatmul.mubr.msk.f32.vlgmr.msra.gmra.mxu0 %vm686_vm6, %v1419_v4  ;;  %4017 = vmatmul.mubr.msk.f32.vlgmr.msra.gmra.mxu1 %vm686_vm6, %v1420_v5 }
 0x489   :  { %1394 = vadd.xlane.f32.xlu1 %v1393_v7  ;;  %4020 = vmatpush3.msra.mxu0 %v1192_v38 }
 0x48a   :  { %4027 = vmatpush3.msra.mxu1 %v1233_v37  ;;  %4021 = vmatprep.subr.mxu0 %v4584_v28 }
 0x48b   :  { %4028 = vmatprep.subr.mxu1 %v4586_v63  ;;  %4022 = vmatpush3.msra.mxu0 %v4584_v28 }
 0x48c   :  { %4029 = vmatpush3.msra.mxu1 %v4586_v63  ;;  %4033 = vmatprep.subr.mxu0 %v4621_v58 }
 0x48d   :  { %4040 = vmatprep.subr.mxu1 %v4616_v56 }
 0x500   :  { %v1374_v8 = vpop.xlane.xlu0 %1373 }
 0x504   :  { %v1377_v11 = vpop.xlane.xlu1 %1376  ;;  %v1380_v12 = vpop.xlane.xlu0 %1379 }
 0x509   :  { %v1383_v13 = vpop.xlane.xlu1 %1382  ;;  %v1386_v24 = vpop.xlane.xlu0 %1385 }
 0x50d   :  { %v1389_v25 = vpop.xlane.xlu1 %1388  ;;  %v1392_v40 = vpop.xlane.xlu0 %1391 }
 0x512   :  { %v1395_v41 = vpop.xlane.xlu1 %1394 }
 0x53f   :  { %v1495_v14 = vpop.f32.mrf.mxu0  ;;  %v1573_v15 = vpop.f32.mrf.mxu1 }
 0x540   :  { %v1736_v16 = vrot.slane %v1495_v14, %v4379_v36  ;;  %v1740_v17 = vrot.slane %v1573_v15, %v4379_v36 }
 0x541   :  { %v3997_v18 = vpop.f32.mrf.mxu0  ;;  %v4004_v19 = vpop.f32.mrf.mxu1 }
 0x542   :  { %v1749_v20 = vadd.f32 %v1736_v16, %v1374_v8  ;;  %v1750_v21 = vadd.f32 %v1736_v16, %v1377_v11  ;;  %v1751_v22 = vadd.f32 %v1740_v17, %v1380_v12  ;;  %v1752_v23 = vadd.f32 %v1740_v17, %v1383_v13 }
 0x544   :  { %v1765_v9 = vmul.f32 0.2, %v1749_v20  ;;  %v1766_v28 = vmul.f32 0.2, %v1750_v21  ;;  %v1767_v63 = vmul.f32 0.2, %v1751_v22 }
 0x545   :  { %v1768_v29 = vmul.f32 0.2, %v1752_v23  ;;  %vm1758_vm11 = vcmp.ge.f32.partialorder %v1750_v21, 0.0  ;;  %vm1757_vm12 = vcmp.ge.f32.partialorder %v1749_v20, 0.0  ;;  %vm1760_vm13 = vcmp.ge.f32.partialorder %v1752_v23, 0.0 }
 0x546   :  { %v1774_v1 = vsel %vm1758_vm11, %v1750_v21, %v1766_v28  ;;  %v1773_v10 = vsel %vm1757_vm12, %v1749_v20, %v1765_v9  ;;  %vm1759_vm14 = vcmp.ge.f32.partialorder %v1751_v22, 0.0  ;;  %vm3489_vm12 = vcmask 31744  }
 0x547   :  { %v1782_v30 = vadd.f32 %v3676_v26, %v1774_v1  ;;  %v1781_v31 = vadd.f32 %v3675_v27, %v1773_v10  ;;  %v1776_v32 = vsel %vm1760_vm13, %v1752_v23, %v1768_v29  ;;  %v1775_v33 = vsel %vm1759_vm14, %v1751_v22, %v1767_v63 }
 0x548   :  { %v1651_v35 = vpop.f32.mrf.mxu0  ;;  %v1729_v37 = vpop.f32.mrf.mxu1  ;;  %v1784_v38 = vadd.f32 %v3676_v26, %v1776_v32  ;;  %v1783_v39 = vadd.f32 %v3675_v27, %v1775_v33 }
 0x549   :  { %v1744_v42 = vrot.slane %v1651_v35, %v4379_v36  ;;  %v1748_v43 = vrot.slane %v1729_v37, %v4379_v36  ;;  %v1792_v44 = vsel %vm686_vm6, %v1782_v30, -inf  ;;  %v1789_v45 = vsel %vm686_vm6, %v1781_v31, -inf }
 0x54a   :  { %v4011_v46 = vpop.f32.mrf.mxu0  ;;  %1793 = vmax.xlane.f32.xlu1 %v1792_v44  ;;  %1790 = vmax.xlane.f32.xlu0 %v1789_v45  ;;  %v4018_v49 = vpop.f32.mrf.mxu1  ;;  %v1798_v54 = vsel %vm686_vm6, %v1784_v38, -inf  ;;  %v1795_v55 = vsel %vm686_vm6, %v1783_v39, -inf }
 0x54b   :  { %v1753_v50 = vadd.f32 %v1744_v42, %v1386_v24  ;;  %v1754_v51 = vadd.f32 %v1744_v42, %v1389_v25  ;;  %v1755_v52 = vadd.f32 %v1748_v43, %v1392_v40  ;;  %v1756_v53 = vadd.f32 %v1748_v43, %v1395_v41 }
 0x54d   :  { %v1769_v57 = vmul.f32 0.2, %v1753_v50  ;;  %v1770_v59 = vmul.f32 0.2, %v1754_v51  ;;  %v1771_v60 = vmul.f32 0.2, %v1755_v52 }
 0x54e   :  { %v1772_v61 = vmul.f32 0.2, %v1756_v53  ;;  %1799 = vmax.xlane.f32.xlu1 %v1798_v54  ;;  %1796 = vmax.xlane.f32.xlu0 %v1795_v55  ;;  %vm1762_vm15 = vcmp.ge.f32.partialorder %v1754_v51, 0.0  ;;  %vm1761_vm1 = vcmp.ge.f32.partialorder %v1753_v50, 0.0  ;;  %vm1764_vm2 = vcmp.ge.f32.partialorder %v1756_v53, 0.0 }
 0x54f   :  { %v1778_v62 = vsel %vm1762_vm15, %v1754_v51, %v1770_v59  ;;  %v1777_v0 = vsel %vm1761_vm1, %v1753_v50, %v1769_v57  ;;  %vm1763_vm3 = vcmp.ge.f32.partialorder %v1755_v52, 0.0 }
 0x550   :  { %v1786_v2 = vadd.f32 %v3676_v26, %v1778_v62  ;;  %v1785_v4 = vadd.f32 %v3675_v27, %v1777_v0  ;;  %v1780_v5 = vsel %vm1764_vm2, %v1756_v53, %v1772_v61  ;;  %v1779_v6 = vsel %vm1763_vm3, %v1755_v52, %v1771_v60 }
 0x551   :  { %v1788_v11 = vadd.f32 %v3676_v26, %v1780_v5  ;;  %v1787_v12 = vadd.f32 %v3675_v27, %v1779_v6 }
 0x552   :  { %v1804_v7 = vsel %vm686_vm6, %v1786_v2, -inf  ;;  %v1801_v8 = vsel %vm686_vm6, %v1785_v4, -inf }
 0x553   :  { %1805 = vmax.xlane.f32.xlu1 %v1804_v7  ;;  %1802 = vmax.xlane.f32.xlu0 %v1801_v8  ;;  %v1810_v13 = vsel %vm686_vm6, %v1788_v11, -inf  ;;  %v1807_v14 = vsel %vm686_vm6, %v1787_v12, -inf }
 0x557   :  { %1811 = vmax.xlane.f32.xlu1 %v1810_v13  ;;  %1808 = vmax.xlane.f32.xlu0 %v1807_v14 }
 0x5d3   :  { %v1794_v15 = vpop.xlane.xlu1 %1793  ;;  %v1791_v16 = vpop.xlane.xlu0 %1790 }
 0x5d4   :  { %v1814_v17 = vsub.f32 %v1782_v30, %v1794_v15  ;;  %v1813_v18 = vsub.f32 %v1781_v31, %v1791_v16 }
 0x5d6   :  { %v1823_v19 = vmul.f32 1.442695, %v1814_v17  ;;  %v1821_v20 = vmul.f32 1.442695, %v1813_v18 }
 0x5d7   :  { %v1800_v21 = vpop.xlane.xlu1 %1799  ;;  %v1797_v22 = vpop.xlane.xlu0 %1796 }
 0x5d8   :  { %4186 = vpow2.f32 %v1823_v19  ;;  %v1816_v23 = vsub.f32 %v1784_v38, %v1800_v21  ;;  %v1815_v24 = vsub.f32 %v1783_v39, %v1797_v22  ;;  %v2226_v22 = vld [vmem:[%s4918_s2 + $0x148] sm:$0xff] }
 0x5d9   :  { %4188 = vpow2.f32 %v1821_v20  ;;  %v2225_v20 = vld [vmem:[%s4918_s2 + $0x140] sm:$0xff] }
 0x5da   :  { %v1827_v25 = vmul.f32 1.442695, %v1816_v23  ;;  %v1825_v26 = vmul.f32 1.442695, %v1815_v24  ;;  %v2239_v23 = vpack.c.bf16 %v2226_v22, %v2225_v20 }
 0x5dc   :  { %4190 = vpow2.f32 %v1827_v25  ;;  %v1806_v27 = vpop.xlane.xlu1 %1805  ;;  %v1803_v9 = vpop.xlane.xlu0 %1802 }
 0x5dd   :  { %4192 = vpow2.f32 %v1825_v26  ;;  %v1818_v28 = vsub.f32 %v1786_v2, %v1806_v27  ;;  %v1817_v63 = vsub.f32 %v1785_v4, %v1803_v9 }
 0x5df   :  { %v1831_v29 = vmul.f32 1.442695, %v1818_v28  ;;  %v1829_v1 = vmul.f32 1.442695, %v1817_v63 }
 0x5e0   :  { %v1812_v10 = vpop.xlane.xlu1 %1811  ;;  %v1809_v30 = vpop.xlane.xlu0 %1808 }
 0x5e1   :  { %4194 = vpow2.f32 %v1831_v29  ;;  %v1820_v31 = vsub.f32 %v1788_v11, %v1812_v10  ;;  %v1819_v32 = vsub.f32 %v1787_v12, %v1809_v30 }
 0x5e2   :  { %4196 = vpow2.f32 %v1829_v1 }
 0x5e3   :  { %v1835_v33 = vmul.f32 1.442695, %v1820_v31  ;;  %v1833_v35 = vmul.f32 1.442695, %v1819_v32 }
 0x5e5   :  { %v4187_v37 = vpop.eup %4186  ;;  %4198 = vpow2.f32 %v1835_v33 }
 0x5e6   :  { %v4189_v38 = vpop.eup %4188  ;;  %4200 = vpow2.f32 %v1833_v35  ;;  %v1840_v39 = vsel %vm686_vm6, %v4187_v37, 0.0 }
 0x5e7   :  { %1841 = vadd.xlane.f32.xlu1 %v1840_v39  ;;  %v1837_v40 = vsel %vm686_vm6, %v4189_v38, 0.0 }
 0x5e8   :  { %1838 = vadd.xlane.f32.xlu0 %v1837_v40 }
 0x5e9   :  { %v4191_v41 = vpop.eup %4190 }
 0x5ea   :  { %v4193_v42 = vpop.eup %4192  ;;  %v1846_v43 = vsel %vm686_vm6, %v4191_v41, 0.0 }
 0x5eb   :  { %1847 = vadd.xlane.f32.xlu1 %v1846_v43  ;;  %v1843_v44 = vsel %vm686_vm6, %v4193_v42, 0.0 }
 0x5ec   :  { %1844 = vadd.xlane.f32.xlu0 %v1843_v44 }
 0x5ee   :  { %v4195_v45 = vpop.eup %4194 }
 0x5ef   :  { %v4197_v46 = vpop.eup %4196  ;;  %v1852_v49 = vsel %vm686_vm6, %v4195_v45, 0.0 }
 0x5f0   :  { %1853 = vadd.xlane.f32.xlu1 %v1852_v49  ;;  %v1849_v50 = vsel %vm686_vm6, %v4197_v46, 0.0 }
 0x5f1   :  { %1850 = vadd.xlane.f32.xlu0 %v1849_v50  ;;  %v2228_v50 = vld [vmem:[%s4918_s2 + $0x158] sm:$0xff] }
 0x5f2   :  { %v4199_v51 = vpop.eup %4198 }
 0x5f3   :  { %v4201_v52 = vpop.eup %4200  ;;  %v1858_v53 = vsel %vm686_vm6, %v4199_v51, 0.0 }
 0x5f4   :  { %1859 = vadd.xlane.f32.xlu1 %v1858_v53  ;;  %v1855_v54 = vsel %vm686_vm6, %v4201_v52, 0.0 }
 0x5f5   :  { %1856 = vadd.xlane.f32.xlu0 %v1855_v54 }
 0x670   :  { %v1842_v55 = vpop.xlane.xlu1 %1841 }
 0x671   :  { %4202 = vrcp.f32 %v1842_v55  ;;  %v1839_v57 = vpop.xlane.xlu0 %1838 }
 0x672   :  { %4204 = vrcp.f32 %v1839_v57 }
 0x674   :  { %v1848_v59 = vpop.xlane.xlu1 %1847 }
 0x675   :  { %4206 = vrcp.f32 %v1848_v59  ;;  %v1845_v60 = vpop.xlane.xlu0 %1844 }
 0x676   :  { %4208 = vrcp.f32 %v1845_v60  ;;  %v3710_v60 = vld.sshfl [vmem:[%s4918_s2 + $0x178] sm:$0x33 pattern:$0x75316420] }
 0x679   :  { %v1854_v61 = vpop.xlane.xlu1 %1853 }
 0x67a   :  { %4210 = vrcp.f32 %v1854_v61  ;;  %v1851_v62 = vpop.xlane.xlu0 %1850  ;;  %v2417_v61 = vcombine.high %v3710_v60, %v3710_v60 }
 0x67b   :  { %4212 = vrcp.f32 %v1851_v62  ;;  %v2424_v62 = vrot.slane %v3710_v60, %v4377_v34 }
 0x67d   :  { %v1860_v0 = vpop.xlane.xlu1 %1859 }
 0x67e   :  { %v4203_v2 = vpop.eup %4202  ;;  %4214 = vrcp.f32 %v1860_v0  ;;  %v1857_v4 = vpop.xlane.xlu0 %1856  ;;  %v2431_v0 = vrot.slane %v2417_v61, %v4377_v34  ;;  %v3705_v61 = vld [vmem:[%s4917_s1 + $0x28] sm:$0xff] }
 0x67f   :  { %v4205_v5 = vpop.eup %4204  ;;  %4216 = vrcp.f32 %v1857_v4  ;;  %v1870_v6 = vmul.f32 %v4203_v2, %v4187_v37  ;;  %v2437_v2 = vrot.slane %v2424_v62, %v4379_v36 }
 0x680   :  { %v1869_v7 = vmul.f32 %v4205_v5, %v4189_v38  ;;  %v2441_v4 = vrot.slane %v2431_v0, %v4379_v36 }
 0x682   :  { %v4207_v8 = vpop.eup %4206  ;;  %4023 = vmatprep.mubr.msk.f32.mxu0 %vm686_vm6, %v1869_v7 }
 0x683   :  { %v4209_v11 = vpop.eup %4208  ;;  %4024 = vmatmul.mubr.msk.f32.vlgmr.msra.gmra.mxu0 %vm686_vm6, %v1870_v6  ;;  %v1872_v12 = vmul.f32 %v4207_v8, %v4191_v41  ;;  %v3711_v8 = vld.sshfl [vmem:[%s4918_s2 + $0x170] sm:$0x33 pattern:$0x75316420] }
 0x684   :  { %4034 = vmatpush3.msra.mxu0 %v4621_v58  ;;  %v1871_v13 = vmul.f32 %v4209_v11, %v4193_v42  ;;  %v2432_v11 = vcombine.high %v2424_v62, %v2424_v62  ;;  %v3704_v62 = vld [vmem:[%s4917_s1 + $0x20] sm:$0xff] }
 0x685   :  { %4035 = vmatprep.subr.mxu0 %v4604_v48 }
 0x686   :  { %4036 = vmatpush3.msra.mxu0 %v4604_v48  ;;  %4030 = vmatprep.mubr.msk.f32.mxu1 %vm686_vm6, %v1871_v13 }
 0x687   :  { %v4211_v14 = vpop.eup %4210  ;;  %4031 = vmatmul.mubr.msk.f32.vlgmr.msra.gmra.mxu1 %vm686_vm6, %v1872_v12  ;;  %4047 = vmatprep.subr.bf16.mxu0 %v4270_v3 }
 0x688   :  { %v4213_v15 = vpop.eup %4212  ;;  %4041 = vmatpush3.msra.mxu1 %v4616_v56  ;;  %v1874_v16 = vmul.f32 %v4211_v14, %v4195_v45  ;;  %v2224_v56 = vld [vmem:[%s4918_s2 + $0x138] sm:$0xff]  ;;  %v3703_v45 = vld [vmem:[%s4918_s2 + $0x128] ss:$0 sm:$0xff] }
 0x689   :  { %4042 = vmatprep.subr.mxu1 %v4602_v47  ;;  %v1873_v17 = vmul.f32 %v4213_v15, %v4197_v46  ;;  %v2227_v46 = vld [vmem:[%s4918_s2 + $0x150] sm:$0xff] }
 0x68a   :  { %4043 = vmatpush3.msra.mxu1 %v4602_v47  ;;  %v2223_v47 = vld [vmem:[%s4918_s2 + $0x130] sm:$0xff]  ;;  %v2240_v55 = vpack.c.bf16 %v2228_v50, %v2227_v46 }
 0x68b   :  { %v4215_v58 = vpop.eup %4214  ;;  %4037 = vmatprep.mubr.msk.f32.mxu0 %vm686_vm6, %v1873_v17  ;;  %4053 = vmatprep.subr.bf16.mxu1 %v4270_v3  ;;  %v2238_v21 = vpack.c.bf16 %v2224_v56, %v2223_v47 }
 0x68c   :  { %v4217_v48 = vpop.eup %4216  ;;  %4038 = vmatmul.mubr.msk.f32.vlgmr.msra.gmra.mxu0 %vm686_vm6, %v1874_v16  ;;  %v1876_v18 = vmul.f32 %v4215_v58, %v4199_v51  ;;  %v2229_v51 = vld [vmem:[%s4918_s2 + $0x160] sm:$0xff]  ;;  %v2433_v16 = vcombine.high %v2431_v0, %v2431_v0 }
 0x68d   :  { %v1875_v19 = vmul.f32 %v4217_v48, %v4201_v52  ;;  %4049 = vmatprep.mubr.msk.bf16.mxu0 %vm4271_vm0, %v4270_v3  ;;  %4048 = vmatpush3.bf16.msra.mxu0 %v2238_v21  ;;  %v2230_v52 = vld [vmem:[%s4918_s2 + $0x168] sm:$0xff]  ;;  %v2494_v48 = vcombine.high %v3711_v8, %v3711_v8 }
 0x68e   :  { %4059 = vmatprep.subr.bf16.mxu0 %v4270_v3  ;;  %v2241_v57 = vpack.c.bf16 %v2230_v52, %v2229_v51  ;;  %v2449_v22 = vrot.slane %v2433_v16, %v4379_v36 }
 0x68f   :  { %4044 = vmatprep.mubr.msk.f32.mxu1 %vm686_vm6, %v1875_v19  ;;  %v2445_v19 = vrot.slane %v2432_v11, %v4379_v36 }
 0x690   :  { %4045 = vmatmul.mubr.msk.f32.vlgmr.msra.gmra.mxu1 %vm686_vm6, %v1876_v18 }
 0x691   :  { %4055 = vmatprep.mubr.msk.bf16.mxu1 %vm4271_vm0, %v4270_v3  ;;  %4054 = vmatpush3.bf16.msra.mxu1 %v2239_v23 }
 0x692   :  { %4065 = vmatprep.subr.bf16.mxu1 %v4270_v3 }
 0x743   :  { %v4025_v24 = vpop.f32.mrf.mxu0 }
 0x744   :  { %v2208_v63 = vsel %vm686_vm6, %v4025_v24, 0.0 }
 0x745   :  { %v1949_v26 = vpop.f32.mrf.mxu0 }
 0x746   :  { %v2201_v31 = vsel %vm686_vm6, %v1949_v26, 0.0  ;;  %v2508_v26 = vrot.slane %v2494_v48, %v4377_v34 }
 0x747   :  { %v4032_v25 = vpop.f32.mrf.mxu1 }
 0x748   :  { %v2209_v9 = vsel %vm686_vm6, %v4032_v25, 0.0  ;;  %v2501_v25 = vrot.slane %v3711_v8, %v4377_v34 }
 0x749   :  { %v2030_v27 = vpop.f32.mrf.mxu1  ;;  %v2210_v10 = vadd.f32 %v2209_v9, %v2208_v63 }
 0x74a   :  { %v2202_v29 = vsel %vm686_vm6, %v2030_v27, 0.0 }
 0x74b   :  { %v2203_v33 = vadd.f32 %v2202_v29, %v2201_v31 }
 0x74c   :  { %v4039_v28 = vpop.f32.mrf.mxu0 }
 0x74d   :  { %v2211_v1 = vsel %vm686_vm6, %v4039_v28, 0.0 }
 0x74e   :  { %v2111_v30 = vpop.f32.mrf.mxu0  ;;  %v2212_v35 = vadd.f32 %v2211_v1, %v2210_v10 }
 0x74f   :  { %v2204_v32 = vsel %vm686_vm6, %v2111_v30, 0.0 }
 0x750   :  { %v4046_v37 = vpop.f32.mrf.mxu1  ;;  %v2205_v39 = vadd.f32 %v2204_v32, %v2203_v33 }
 0x751   :  { %v2213_v38 = vsel %vm686_vm6, %v4046_v37, 0.0 }
 0x752   :  { %v2214_v40 = vadd.f32 %v2213_v38, %v2212_v35  ;;  %v2192_v41 = vpop.f32.mrf.mxu1  ;;  %v2509_v38 = vcombine.high %v2501_v25, %v2501_v25 }
 0x753   :  { %v2206_v42 = vsel %vm686_vm6, %v2192_v41, 0.0 }
 0x754   :  { %v2216_v43 = vmul.f32 0.25, %v2214_v40  ;;  %v2207_v44 = vadd.f32 %v2206_v42, %v2205_v39  ;;  %v2510_v39 = vcombine.high %v2508_v26, %v2508_v26 }
 0x756   :  { %v2215_v49 = vmul.f32 0.25, %v2207_v44  ;;  %v2222_v53 = vadd.f32 %v3703_v45, %v2216_v43 }
 0x758   :  { %v2221_v54 = vadd.f32 %v3703_v45, %v2215_v49 }
 0x75a   :  { %v2237_v59 = vpack.c.bf16 %v2222_v53, %v2221_v54 }
 0x75c   :  { %4050 = vmatmul.mubr.msk.bf16.vlgmr.msra.gmra.mxu0 %vm686_vm6, %v2237_v59  ;;  %4056 = vmatmul.mubr.msk.bf16.vlgmr.msra.gmra.mxu1 %vm686_vm6, %v2237_v59 }
 0x75d   :  { %4060 = vmatpush3.bf16.msra.mxu0 %v2240_v55  ;;  %4066 = vmatpush3.bf16.msra.mxu1 %v2241_v57 }
 0x75e   :  { %4061 = vmatprep.mubr.msk.bf16.mxu0 %vm4271_vm0, %v4270_v3  ;;  %4067 = vmatprep.mubr.msk.bf16.mxu1 %vm4271_vm0, %v4270_v3 }
 0x75f   :  { %4071 = vmatprep.subr.mxu0 %v4270_v3  ;;  %4078 = vmatprep.subr.mxu1 %v4270_v3 }
 0x764   :  { %4062 = vmatmul.mubr.msk.bf16.vlgmr.msra.gmra.mxu0 %vm686_vm6, %v2237_v59  ;;  %4068 = vmatmul.mubr.msk.bf16.vlgmr.msra.gmra.mxu1 %vm686_vm6, %v2237_v59 }
 0x765   :  { %4075 = vmatprep.mubr.msk.f32.mxu0 %vm4271_vm0, %v4270_v3  ;;  %4082 = vmatprep.mubr.msk.f32.mxu1 %vm4271_vm0, %v4270_v3 }
 0x81c   :  { %v4755_v5 = vpop.f32.mrf.mxu0  ;;  %v4757_v6 = vpop.f32.mrf.mxu1 }
 0x81d   :  { %v2454_v7 = vmul.f32 %v2437_v2, %v4755_v5  ;;  %v2456_v15 = vmul.f32 %v2441_v4, %v4757_v6 }
 0x81e   :  { %v4051_v12 = vpop.f32.mrf.mxu0  ;;  %v4057_v13 = vpop.f32.mrf.mxu1 }
 0x81f   :  { %v2462_v14 = vsel %vm686_vm6, %v2454_v7, 0.0  ;;  %v2468_v20 = vsel %vm686_vm6, %v2456_v15, 0.0 }
 0x820   :  { %v2323_v17 = vpop.f32.mrf.mxu1  ;;  %2463 = vadd.xlane.f32.xlu0 %v2462_v14  ;;  %v2282_v58 = vpop.f32.mrf.mxu0 }
 0x821   :  { %4072 = vmatpush3.xpose.msk.msra.mxu0 %vm686_vm6, %v2282_v58  ;;  %4079 = vmatpush3.xpose.msk.msra.mxu1 %vm686_vm6, %v2323_v17  ;;  %v2455_v18 = vmul.f32 %v2437_v2, %v2282_v58  ;;  %v2457_v27 = vmul.f32 %v2441_v4, %v2323_v17 }
 0x822   :  { %v4052_v47 = vpop.f32.mrf.mxu0  ;;  %v4058_v56 = vpop.f32.mrf.mxu1  ;;  %4080 = vmatprep.subr.mxu1 %v4270_v3  ;;  %4073 = vmatprep.subr.mxu0 %v4270_v3 }
 0x823   :  { %v2465_v21 = vsel %vm686_vm6, %v2455_v18, 0.0  ;;  %v2471_v34 = vsel %vm686_vm6, %v2457_v27, 0.0 }
 0x824   :  { %v4773_v23 = vpop.f32.mrf.mxu1  ;;  %2469 = vadd.xlane.f32.xlu0 %v2468_v20  ;;  %2466 = vadd.xlane.f32.xlu1 %v2465_v21  ;;  %v4775_v24 = vpop.f32.mrf.mxu0 }
 0x825   :  { %4074 = vmatpush3.xpose.msk.msra.mxu0 %vm686_vm6, %v4755_v5  ;;  %4081 = vmatpush3.xpose.msk.msra.mxu1 %vm686_vm6, %v4757_v6  ;;  %v2458_v9 = vmul.f32 %v2445_v19, %v4775_v24  ;;  %v2460_v30 = vmul.f32 %v2449_v22, %v4773_v23 }
 0x826   :  { %v4063_v28 = vpop.f32.mrf.mxu0  ;;  %v4069_v63 = vpop.f32.mrf.mxu1  ;;  %4085 = vmatprep.subr.mxu0 %v4270_v3  ;;  %4092 = vmatprep.subr.mxu1 %v4270_v3 }
 0x827   :  { %v2474_v29 = vsel %vm686_vm6, %v2458_v9, 0.0  ;;  %v2480_v37 = vsel %vm686_vm6, %v2460_v30, 0.0 }
 0x828   :  { %v4787_v1 = vpop.f32.mrf.mxu1  ;;  %4076 = vmatmul.mubr.msk.f32.vlgmr.msra.gmra.mxu0 %vm686_vm6, %v2501_v25  ;;  %4083 = vmatmul.mubr.msk.f32.vlgmr.msra.gmra.mxu1 %vm686_vm6, %v2508_v26  ;;  %v4792_v10 = vpop.f32.mrf.mxu0 }
 0x829   :  { %2472 = vadd.xlane.f32.xlu1 %v2471_v34  ;;  %2475 = vadd.xlane.f32.xlu0 %v2474_v29  ;;  %v2459_v31 = vmul.f32 %v2445_v19, %v4792_v10  ;;  %v2461_v40 = vmul.f32 %v2449_v22, %v4787_v1 }
 0x82a   :  { %4086 = vmatpush3.xpose.msk.msra.mxu0 %vm686_vm6, %v4792_v10  ;;  %4093 = vmatpush3.xpose.msk.msra.mxu1 %vm686_vm6, %v4787_v1  ;;  %v4064_v32 = vpop.f32.mrf.mxu0  ;;  %v4070_v33 = vpop.f32.mrf.mxu1 }
 0x82b   :  { %4094 = vmatprep.subr.mxu1 %v4270_v3  ;;  %4087 = vmatprep.subr.mxu0 %v4270_v3  ;;  %v2477_v35 = vsel %vm686_vm6, %v2459_v31, 0.0 }
 0x82c   :  { %4089 = vmatprep.mubr.msk.f32.mxu0 %vm4271_vm0, %v4270_v3  ;;  %4096 = vmatprep.mubr.msk.f32.mxu1 %vm4271_vm0, %v4270_v3  ;;  %v2483_v3 = vsel %vm686_vm6, %v2461_v40, 0.0 }
 0x82d   :  { %2481 = vadd.xlane.f32.xlu0 %v2480_v37  ;;  %2478 = vadd.xlane.f32.xlu1 %v2477_v35 }
 0x82e   :  { %4088 = vmatpush3.xpose.msk.msra.mxu0 %vm686_vm6, %v4775_v24  ;;  %4095 = vmatpush3.xpose.msk.msra.mxu1 %vm686_vm6, %v4773_v23 }
 0x82f   :  { %4099 = vmatprep.subr.mxu0 %v2282_v58  ;;  %4106 = vmatprep.subr.mxu1 %v2323_v17 }
 0x831   :  { %4090 = vmatmul.mubr.msk.f32.vlgmr.msra.gmra.mxu0 %vm686_vm6, %v2509_v38  ;;  %4097 = vmatmul.mubr.msk.f32.vlgmr.msra.gmra.mxu1 %vm686_vm6, %v2510_v39 }
 0x832   :  { %2484 = vadd.xlane.f32.xlu1 %v2483_v3  ;;  %4100 = vmatpush3.msra.mxu0 %v2282_v58 }
 0x833   :  { %4107 = vmatpush3.msra.mxu1 %v2323_v17  ;;  %4101 = vmatprep.subr.mxu0 %v4755_v5 }
 0x834   :  { %4108 = vmatprep.subr.mxu1 %v4757_v6  ;;  %4102 = vmatpush3.msra.mxu0 %v4755_v5 }
 0x835   :  { %4109 = vmatpush3.msra.mxu1 %v4757_v6  ;;  %4113 = vmatprep.subr.mxu0 %v4792_v10 }
 0x836   :  { %4120 = vmatprep.subr.mxu1 %v4787_v1 }
 0x8a9   :  { %v2464_v41 = vpop.xlane.xlu0 %2463 }
 0x8ad   :  { %v2467_v42 = vpop.xlane.xlu1 %2466  ;;  %v2470_v43 = vpop.xlane.xlu0 %2469 }
 0x8b2   :  { %v2473_v44 = vpop.xlane.xlu1 %2472  ;;  %v2476_v59 = vpop.xlane.xlu0 %2475 }
 0x8b6   :  { %v2479_v60 = vpop.xlane.xlu1 %2478  ;;  %v2482_v58 = vpop.xlane.xlu0 %2481 }
 0x8bb   :  { %v2485_v48 = vpop.xlane.xlu1 %2484 }
 0x8e8   :  { %v2585_v45 = vpop.f32.mrf.mxu0  ;;  %v2663_v46 = vpop.f32.mrf.mxu1 }
 0x8e9   :  { %v2826_v49 = vrot.slane %v2585_v45, %v4379_v36  ;;  %v2830_v50 = vrot.slane %v2663_v46, %v4379_v36 }
 0x8ea   :  { %v4077_v51 = vpop.f32.mrf.mxu0  ;;  %v4084_v52 = vpop.f32.mrf.mxu1 }
 0x8eb   :  { %v2839_v53 = vadd.f32 %v2826_v49, %v2464_v41  ;;  %v2840_v54 = vadd.f32 %v2826_v49, %v2467_v42  ;;  %v2841_v55 = vadd.f32 %v2830_v50, %v2470_v43  ;;  %v2842_v57 = vadd.f32 %v2830_v50, %v2473_v44 }
 0x8ed   :  { %v2855_v0 = vmul.f32 0.2, %v2839_v53  ;;  %v2856_v2 = vmul.f32 0.2, %v2840_v54  ;;  %v2857_v4 = vmul.f32 0.2, %v2841_v55 }
 0x8ee   :  { %v2858_v5 = vmul.f32 0.2, %v2842_v57  ;;  %vm2848_vm0 = vcmp.ge.f32.partialorder %v2840_v54, 0.0  ;;  %vm2847_vm4 = vcmp.ge.f32.partialorder %v2839_v53, 0.0  ;;  %vm2850_vm5 = vcmp.ge.f32.partialorder %v2842_v57, 0.0 }
 0x8ef   :  { %v2864_v6 = vsel %vm2848_vm0, %v2840_v54, %v2856_v2  ;;  %v2863_v7 = vsel %vm2847_vm4, %v2839_v53, %v2855_v0  ;;  %vm2849_vm7 = vcmp.ge.f32.partialorder %v2841_v55, 0.0 }
 0x8f0   :  { %v2872_v8 = vadd.f32 %v3705_v61, %v2864_v6  ;;  %v2871_v11 = vadd.f32 %v3704_v62, %v2863_v7  ;;  %v2866_v12 = vsel %vm2850_vm5, %v2842_v57, %v2858_v5  ;;  %v2865_v13 = vsel %vm2849_vm7, %v2841_v55, %v2857_v4 }
 0x8f1   :  { %v2741_v14 = vpop.f32.mrf.mxu0  ;;  %v2819_v15 = vpop.f32.mrf.mxu1  ;;  %v2874_v16 = vadd.f32 %v3705_v61, %v2866_v12  ;;  %v2873_v17 = vadd.f32 %v3704_v62, %v2865_v13 }
 0x8f2   :  { %v2834_v18 = vrot.slane %v2741_v14, %v4379_v36  ;;  %v2838_v19 = vrot.slane %v2819_v15, %v4379_v36  ;;  %v2882_v47 = vsel %vm686_vm6, %v2872_v8, -inf  ;;  %v2879_v56 = vsel %vm686_vm6, %v2871_v11, -inf }
 0x8f3   :  { %v4091_v20 = vpop.f32.mrf.mxu0  ;;  %2883 = vmax.xlane.f32.xlu1 %v2882_v47  ;;  %2880 = vmax.xlane.f32.xlu0 %v2879_v56  ;;  %v4098_v21 = vpop.f32.mrf.mxu1  ;;  %v2888_v9 = vsel %vm686_vm6, %v2874_v16, -inf  ;;  %v2885_v28 = vsel %vm686_vm6, %v2873_v17, -inf }
 0x8f4   :  { %v2843_v22 = vadd.f32 %v2834_v18, %v2476_v59  ;;  %v2844_v25 = vadd.f32 %v2834_v18, %v2479_v60  ;;  %v2845_v26 = vadd.f32 %v2838_v19, %v2482_v58  ;;  %v2846_v27 = vadd.f32 %v2838_v19, %v2485_v48 }
 0x8f6   :  { %v2859_v63 = vmul.f32 0.2, %v2843_v22  ;;  %v2860_v29 = vmul.f32 0.2, %v2844_v25  ;;  %v2861_v34 = vmul.f32 0.2, %v2845_v26 }
 0x8f7   :  { %v2862_v36 = vmul.f32 0.2, %v2846_v27  ;;  %2889 = vmax.xlane.f32.xlu1 %v2888_v9  ;;  %2886 = vmax.xlane.f32.xlu0 %v2885_v28  ;;  %vm2852_vm8 = vcmp.ge.f32.partialorder %v2844_v25, 0.0  ;;  %vm2851_vm9 = vcmp.ge.f32.partialorder %v2843_v22, 0.0  ;;  %vm2854_vm10 = vcmp.ge.f32.partialorder %v2846_v27, 0.0 }
 0x8f8   :  { %v2868_v30 = vsel %vm2852_vm8, %v2844_v25, %v2860_v29  ;;  %v2867_v31 = vsel %vm2851_vm9, %v2843_v22, %v2859_v63  ;;  %vm2853_vm11 = vcmp.ge.f32.partialorder %v2845_v26, 0.0 }
 0x8f9   :  { %v2876_v32 = vadd.f32 %v3705_v61, %v2868_v30  ;;  %v2875_v33 = vadd.f32 %v3704_v62, %v2867_v31  ;;  %v2870_v35 = vsel %vm2854_vm10, %v2846_v27, %v2862_v36  ;;  %v2869_v37 = vsel %vm2853_vm11, %v2845_v26, %v2861_v34 }
 0x8fa   :  { %v2878_v40 = vadd.f32 %v3705_v61, %v2870_v35  ;;  %v2877_v3 = vadd.f32 %v3704_v62, %v2869_v37 }
 0x8fb   :  { %v2894_v38 = vsel %vm686_vm6, %v2876_v32, -inf  ;;  %v2891_v39 = vsel %vm686_vm6, %v2875_v33, -inf }
 0x8fc   :  { %2895 = vmax.xlane.f32.xlu1 %v2894_v38  ;;  %2892 = vmax.xlane.f32.xlu0 %v2891_v39  ;;  %v2900_v41 = vsel %vm686_vm6, %v2878_v40, -inf  ;;  %v2897_v42 = vsel %vm686_vm6, %v2877_v3, -inf }
 0x900   :  { %2901 = vmax.xlane.f32.xlu1 %v2900_v41  ;;  %2898 = vmax.xlane.f32.xlu0 %v2897_v42 }
 0x97c   :  { %v2884_v43 = vpop.xlane.xlu1 %2883  ;;  %v2881_v44 = vpop.xlane.xlu0 %2880 }
 0x97d   :  { %v2904_v45 = vsub.f32 %v2872_v8, %v2884_v43  ;;  %v2903_v46 = vsub.f32 %v2871_v11, %v2881_v44 }
 0x97f   :  { %v2913_v49 = vmul.f32 1.442695, %v2904_v45  ;;  %v2911_v50 = vmul.f32 1.442695, %v2903_v46 }
 0x980   :  { %v2890_v51 = vpop.xlane.xlu1 %2889  ;;  %v2887_v52 = vpop.xlane.xlu0 %2886 }
 0x981   :  { %4218 = vpow2.f32 %v2913_v49  ;;  %v2906_v53 = vsub.f32 %v2874_v16, %v2890_v51  ;;  %v2905_v54 = vsub.f32 %v2873_v17, %v2887_v52 }
 0x982   :  { %4220 = vpow2.f32 %v2911_v50 }
 0x983   :  { %v2917_v55 = vmul.f32 1.442695, %v2906_v53  ;;  %v2915_v57 = vmul.f32 1.442695, %v2905_v54 }
 0x985   :  { %4222 = vpow2.f32 %v2917_v55  ;;  %v2896_v59 = vpop.xlane.xlu1 %2895  ;;  %v2893_v60 = vpop.xlane.xlu0 %2892 }
 0x986   :  { %4224 = vpow2.f32 %v2915_v57  ;;  %v2908_v61 = vsub.f32 %v2876_v32, %v2896_v59  ;;  %v2907_v62 = vsub.f32 %v2875_v33, %v2893_v60 }
 0x988   :  { %v2921_v0 = vmul.f32 1.442695, %v2908_v61  ;;  %v2919_v2 = vmul.f32 1.442695, %v2907_v62 }
 0x989   :  { %v2902_v4 = vpop.xlane.xlu1 %2901  ;;  %v2899_v5 = vpop.xlane.xlu0 %2898 }
 0x98a   :  { %4226 = vpow2.f32 %v2921_v0  ;;  %v2910_v6 = vsub.f32 %v2878_v40, %v2902_v4  ;;  %v2909_v7 = vsub.f32 %v2877_v3, %v2899_v5 }
 0x98b   :  { %4228 = vpow2.f32 %v2919_v2 }
 0x98c   :  { %v2925_v8 = vmul.f32 1.442695, %v2910_v6  ;;  %v2923_v11 = vmul.f32 1.442695, %v2909_v7 }
 0x98e   :  { %v4219_v12 = vpop.eup %4218  ;;  %4230 = vpow2.f32 %v2925_v8 }
 0x98f   :  { %v4221_v13 = vpop.eup %4220  ;;  %4232 = vpow2.f32 %v2923_v11  ;;  %v2930_v14 = vsel %vm686_vm6, %v4219_v12, 0.0 }
 0x990   :  { %2931 = vadd.xlane.f32.xlu1 %v2930_v14  ;;  %v2927_v15 = vsel %vm686_vm6, %v4221_v13, 0.0 }
 0x991   :  { %2928 = vadd.xlane.f32.xlu0 %v2927_v15 }
 0x992   :  { %v4223_v16 = vpop.eup %4222 }
 0x993   :  { %v4225_v17 = vpop.eup %4224  ;;  %v2936_v58 = vsel %vm686_vm6, %v4223_v16, 0.0 }
 0x994   :  { %2937 = vadd.xlane.f32.xlu1 %v2936_v58  ;;  %v2933_v48 = vsel %vm686_vm6, %v4225_v17, 0.0  ;;  %v3401_v58 = vld [vmem:[%s4918_s2 + $0x1a0] sm:$0xff] }
 0x995   :  { %2934 = vadd.xlane.f32.xlu0 %v2933_v48 }
 0x997   :  { %v4227_v18 = vpop.eup %4226 }
 0x998   :  { %v4229_v19 = vpop.eup %4228  ;;  %v2942_v47 = vsel %vm686_vm6, %v4227_v18, 0.0 }
 0x999   :  { %2943 = vadd.xlane.f32.xlu1 %v2942_v47  ;;  %v2939_v56 = vsel %vm686_vm6, %v4229_v19, 0.0 }
 0x99a   :  { %2940 = vadd.xlane.f32.xlu0 %v2939_v56 }
 0x99b   :  { %v4231_v20 = vpop.eup %4230 }
 0x99c   :  { %v4233_v21 = vpop.eup %4232  ;;  %v2948_v22 = vsel %vm686_vm6, %v4231_v20, 0.0 }
 0x99d   :  { %2949 = vadd.xlane.f32.xlu1 %v2948_v22  ;;  %v2945_v25 = vsel %vm686_vm6, %v4233_v21, 0.0 }
 0x99e   :  { %2946 = vadd.xlane.f32.xlu0 %v2945_v25 }
 0xa19   :  { %v2932_v26 = vpop.xlane.xlu1 %2931 }
 0xa1a   :  { %4234 = vrcp.f32 %v2932_v26  ;;  %v2929_v27 = vpop.xlane.xlu0 %2928 }
 0xa1b   :  { %4236 = vrcp.f32 %v2929_v27 }
 0xa1d   :  { %v2938_v9 = vpop.xlane.xlu1 %2937 }
 0xa1e   :  { %4238 = vrcp.f32 %v2938_v9  ;;  %v2935_v28 = vpop.xlane.xlu0 %2934 }
 0xa1f   :  { %4240 = vrcp.f32 %v2935_v28  ;;  %v3739_v28 = vld [vmem:[%s4917_s1 + $0x30] sm:$0xff] }
 0xa22   :  { %v2944_v63 = vpop.xlane.xlu1 %2943 }
 0xa23   :  { %4242 = vrcp.f32 %v2944_v63  ;;  %v2941_v29 = vpop.xlane.xlu0 %2940 }
 0xa24   :  { %4244 = vrcp.f32 %v2941_v29 }
 0xa26   :  { %v2950_v34 = vpop.xlane.xlu1 %2949 }
 0xa27   :  { %v4235_v36 = vpop.eup %4234  ;;  %4246 = vrcp.f32 %v2950_v34  ;;  %v2947_v30 = vpop.xlane.xlu0 %2946 }
 0xa28   :  { %v4237_v31 = vpop.eup %4236  ;;  %4248 = vrcp.f32 %v2947_v30  ;;  %v2960_v32 = vmul.f32 %v4235_v36, %v4219_v12 }
 0xa29   :  { %v2959_v33 = vmul.f32 %v4237_v31, %v4221_v13  ;;  %v3732_v13 = vld [vmem:[%s4918_s2 + $0x180] ss:$0 sm:$0xff] }
 0xa2b   :  { %v4239_v35 = vpop.eup %4238  ;;  %4103 = vmatprep.mubr.msk.f32.mxu0 %vm686_vm6, %v2959_v33 }
 0xa2c   :  { %v4241_v37 = vpop.eup %4240  ;;  %4104 = vmatmul.mubr.msk.f32.vlgmr.msra.gmra.mxu0 %vm686_vm6, %v2960_v32  ;;  %v2962_v38 = vmul.f32 %v4239_v35, %v4223_v16 }
 0xa2d   :  { %4114 = vmatpush3.msra.mxu0 %v4792_v10  ;;  %v2961_v39 = vmul.f32 %v4241_v37, %v4225_v17  ;;  %v3402_v17 = vld [vmem:[%s4918_s2 + $0x1a8] sm:$0xff]  ;;  %v3740_v37 = vld [vmem:[%s4917_s1 + $0x38] sm:$0xff] }
 0xa2e   :  { %4115 = vmatprep.subr.mxu0 %v4775_v24 }
 0xa2f   :  { %4116 = vmatpush3.msra.mxu0 %v4775_v24  ;;  %4110 = vmatprep.mubr.msk.f32.mxu1 %vm686_vm6, %v2961_v39  ;;  %v3515_v39 = vsel %vm686_vm6, %v3739_v28, 0.0 }
 0xa30   :  { %v4243_v40 = vpop.eup %4242  ;;  %4111 = vmatmul.mubr.msk.f32.vlgmr.msra.gmra.mxu1 %vm686_vm6, %v2962_v38 }
 0xa31   :  { %v4245_v3 = vpop.eup %4244  ;;  %4121 = vmatpush3.msra.mxu1 %v4787_v1  ;;  %v2964_v41 = vmul.f32 %v4243_v40, %v4227_v18  ;;  %v3314_v1 = vld [vmem:[%s4918_s2 + $0x190] sm:$0xff]  ;;  %v3733_v18 = vld [vmem:[%s4918_s2 + $0x198] ss:$0 sm:$0xff]  ;;  %v3518_v40 = vsel %vm686_vm6, %v3740_v37, 0.0 }
 0xa32   :  { %4122 = vmatprep.subr.mxu1 %v4773_v23  ;;  %v2963_v42 = vmul.f32 %v4245_v3, %v4229_v19  ;;  %4127 = vmatprep.subr.mxu0 %v3314_v1 }
 0xa33   :  { %4123 = vmatpush3.msra.mxu1 %v4773_v23  ;;  %v3313_v23 = vld [vmem:[%s4918_s2 + $0x188] sm:$0xff] }
 0xa34   :  { %v4247_v10 = vpop.eup %4246  ;;  %4117 = vmatprep.mubr.msk.f32.mxu0 %vm686_vm6, %v2963_v42  ;;  %4134 = vmatprep.subr.mxu1 %v3402_v17 }
 0xa35   :  { %v4249_v43 = vpop.eup %4248  ;;  %4118 = vmatmul.mubr.msk.f32.vlgmr.msra.gmra.mxu0 %vm686_vm6, %v2964_v41  ;;  %v2966_v24 = vmul.f32 %v4247_v10, %v4231_v20  ;;  %v3736_v20 = vld [vmem:[%s4918_s2 + $0x1b0] ss:$0 sm:$0xff] }
 0xa36   :  { %v2965_v44 = vmul.f32 %v4249_v43, %v4233_v21  ;;  %4128 = vmatpush3.msra.mxu0 %v3314_v1 }
 0xa37   :  { %4129 = vmatprep.subr.mxu0 %v3313_v23 }
 0xa38   :  { %4124 = vmatprep.mubr.msk.f32.mxu1 %vm686_vm6, %v2965_v44  ;;  %4130 = vmatpush3.msra.mxu0 %v3313_v23 }
 0xa39   :  { %4125 = vmatmul.mubr.msk.f32.vlgmr.msra.gmra.mxu1 %vm686_vm6, %v2966_v24 }
 0xa3a   :  { %4135 = vmatpush3.msra.mxu1 %v3402_v17 }
 0xa3b   :  { %4136 = vmatprep.subr.mxu1 %v3401_v58 }
 0xa3c   :  { %4137 = vmatpush3.msra.mxu1 %v3401_v58 }
 0xaec   :  { %v4105_v45 = vpop.f32.mrf.mxu0 }
 0xaed   :  { %v3298_v53 = vsel %vm686_vm6, %v4105_v45, 0.0 }
 0xaee   :  { %v3039_v49 = vpop.f32.mrf.mxu0 }
 0xaef   :  { %v3291_v60 = vsel %vm686_vm6, %v3039_v49, 0.0 }
 0xaf0   :  { %v4112_v46 = vpop.f32.mrf.mxu1 }
 0xaf1   :  { %v3299_v51 = vsel %vm686_vm6, %v4112_v46, 0.0 }
 0xaf2   :  { %v3120_v50 = vpop.f32.mrf.mxu1  ;;  %v3300_v57 = vadd.f32 %v3299_v51, %v3298_v53 }
 0xaf3   :  { %v3292_v54 = vsel %vm686_vm6, %v3120_v50, 0.0 }
 0xaf4   :  { %v3293_v62 = vadd.f32 %v3292_v54, %v3291_v60 }
 0xaf5   :  { %v4119_v52 = vpop.f32.mrf.mxu0 }
 0xaf6   :  { %v3301_v55 = vsel %vm686_vm6, %v4119_v52, 0.0 }
 0xaf7   :  { %v3201_v59 = vpop.f32.mrf.mxu0  ;;  %v3302_v0 = vadd.f32 %v3301_v55, %v3300_v57 }
 0xaf8   :  { %v3294_v61 = vsel %vm686_vm6, %v3201_v59, 0.0 }
 0xaf9   :  { %v4126_v2 = vpop.f32.mrf.mxu1  ;;  %v3295_v5 = vadd.f32 %v3294_v61, %v3293_v62 }
 0xafa   :  { %v3303_v4 = vsel %vm686_vm6, %v4126_v2, 0.0 }
 0xafb   :  { %v3304_v6 = vadd.f32 %v3303_v4, %v3302_v0  ;;  %v3282_v7 = vpop.f32.mrf.mxu1 }
 0xafc   :  { %v3296_v8 = vsel %vm686_vm6, %v3282_v7, 0.0 }
 0xafd   :  { %v3297_v11 = vadd.f32 %v3296_v8, %v3295_v5  ;;  %v3306_v12 = vmul.f32 0.25, %v3304_v6 }
 0xaff   :  { %v3305_v14 = vmul.f32 0.25, %v3297_v11  ;;  %v3312_v16 = vadd.f32 %v3732_v13, %v3306_v12 }
 0xb01   :  { %v3311_v15 = vadd.f32 %v3732_v13, %v3305_v14 }
 0xb03   :  { %4131 = vmatprep.mubr.msk.f32.mxu0 %vm686_vm6, %v3311_v15 }
 0xb04   :  { %4132 = vmatmul.mubr.msk.f32.vlgmr.msra.gmra.mxu0 %vm686_vm6, %v3312_v16 }
 0xb05   :  { %4145 = vmatprep.mubr.msk.f32.mxu0 %vm686_vm6, %v3739_v28 }
 0xbc4   :  { %v4133_v48 = vpop.f32.mrf.mxu0 }
 0xbc5   :  { %v3398_v56 = vadd.f32 %v4133_v48, %v3733_v18 }
 0xbc6   :  { %v3392_v19 = vpop.f32.mrf.mxu0 }
 0xbc7   :  { %v3393_v47 = vadd.f32 %v3733_v18, %v3392_v19 }
 0xbc9   :  { %4138 = vmatprep.mubr.msk.f32.mxu1 %vm686_vm6, %v3393_v47 }
 0xbca   :  { %4139 = vmatmul.mubr.msk.f32.vlgmr.msra.gmra.mxu1 %vm686_vm6, %v3398_v56 }
 0xc8a   :  { %v4140_v21 = vpop.f32.mrf.mxu1 }
 0xc8b   :  { %v3486_v22 = vadd.f32 %v4140_v21, %v3736_v20 }
 0xc8c   :  { %v3480_v25 = vpop.f32.mrf.mxu1 }
 0xc8d   :  { %v3481_v26 = vadd.f32 %v3736_v20, %v3480_v25  ;;  %v3493_v27 = vsel %vm3489_vm12, %v3486_v22, -inf }
 0xc8e   :  { %3494 = vmax.xlane.f32.xlu0 %v3493_v27 }
 0xc8f   :  { %v3490_v9 = vsel %vm3489_vm12, %v3481_v26, -inf }
 0xc90   :  { %3491 = vmax.xlane.f32.xlu1 %v3490_v9 }
 0xd17   :  { %v3495_v63 = vpop.xlane.xlu0 %3494 }
 0xd18   :  { %v3497_v29 = vsub.f32 %v3486_v22, %v3495_v63 }
 0xd19   :  { %v3492_v34 = vpop.xlane.xlu1 %3491 }
 0xd1a   :  { %v3500_v36 = vmul.f32 1.442695, %v3497_v29  ;;  %v3496_v30 = vsub.f32 %v3481_v26, %v3492_v34 }
 0xd1c   :  { %4250 = vpow2.f32 %v3500_v36  ;;  %v3498_v31 = vmul.f32 1.442695, %v3496_v30 }
 0xd1e   :  { %4252 = vpow2.f32 %v3498_v31 }
 0xd29   :  { %v4251_v32 = vpop.eup %4250 }
 0xd2a   :  { %v3505_v33 = vsel %vm3489_vm12, %v4251_v32, 0.0 }
 0xd2b   :  { %v4253_v35 = vpop.eup %4252  ;;  %3506 = vadd.xlane.f32.xlu0 %v3505_v33 }
 0xd2c   :  { %v3502_v38 = vsel %vm3489_vm12, %v4253_v35, 0.0 }
 0xd2d   :  { %3503 = vadd.xlane.f32.xlu1 %v3502_v38 }
 0xd2f   :  { %3516 = vadd.xlane.f32.xlu0 %v3515_v39 }
 0xd31   :  { %3519 = vadd.xlane.f32.xlu1 %v3518_v40 }
 0xdb4   :  { %v3507_v3 = vpop.xlane.xlu0 %3506 }
 0xdb5   :  { %4254 = vrcp.f32 %v3507_v3 }
 0xdb6   :  { %v3504_v41 = vpop.xlane.xlu1 %3503 }
 0xdb7   :  { %4256 = vrcp.f32 %v3504_v41 }
 0xdb8   :  { %v3517_v44 = vpop.xlane.xlu0 %3516 }
 0xdba   :  { %v3520_v1 = vpop.xlane.xlu1 %3519 }
 0xdc2   :  { %v4255_v42 = vpop.eup %4254 }
 0xdc3   :  { %v3511_v10 = vmul.f32 %v4255_v42, %v4251_v32 }
 0xdc4   :  { %v4257_v43 = vpop.eup %4256 }
 0xdc5   :  { %4141 = vmatprep.subr.mxu0 %v3511_v10  ;;  %v3509_v24 = vmul.f32 %v4257_v43, %v4253_v35  ;;  %v3605_v45 = vmul.f32 %v3520_v1, %v3511_v10 }
 0xdc6   :  { %4142 = vmatpush3.msra.mxu0 %v3511_v10 }
 0xdc7   :  { %4143 = vmatprep.subr.mxu0 %v3509_v24  ;;  %v3604_v23 = vmul.f32 %v3517_v44, %v3509_v24  ;;  %v3607_v49 = vsel %vm3489_vm12, %v3605_v45, 0.0 }
 0xdc8   :  { %4144 = vmatpush3.msra.mxu0 %v3509_v24 }
 0xdc9   :  { %4146 = vmatmul.mubr.msk.f32.vlgmr.msra.gmra.mxu0 %vm686_vm6, %v3740_v37  ;;  %v3606_v46 = vsel %vm3489_vm12, %v3604_v23, 0.0 }
 0xdca   :  { %v3608_v50 = vadd.f32 %v3607_v49, %v3606_v46 }
 0xdcc   :  { %v3609_v51 = vrot.slane %v3608_v50, 4 }
 0xdce   :  { %v3610_v52 = vadd.f32 %v3609_v51, %v3608_v50 }
 0xdd0   :  { %v3611_v53 = vrot.slane %v3610_v52, 2 }
 0xdd2   :  { %v3612_v54 = vadd.f32 %v3611_v53, %v3610_v52 }
 0xdd4   :  { %v3613_v55 = vrot.slane %v3612_v54, 1 }
 0xdd6   :  { %v3614_v57 = vadd.f32 %v3613_v55, %v3612_v54 }
 0xdd8   :  { %v3617_v59 = vadd.f32 1e-12, %v3614_v57 }
 0xdda   :  { %4258 = vrcp.f32 %v3617_v59 }
 0xde7   :  { %v4259_v4 = vpop.eup %4258 }
 0xe89   :  { %v4147_v60 = vpop.f32.mrf.mxu0 }
 0xe8a   :  { %v3603_v61 = vsub.f32 %v3520_v1, %v4147_v60 }
 0xe8b   :  { %v3593_v62 = vpop.f32.mrf.mxu0 }
 0xe8c   :  { %v3616_v0 = vmul.f32 %v3603_v61, %v3511_v10  ;;  %v3602_v2 = vsub.f32 %v3517_v44, %v3593_v62 }
 0xe8e   :  { %v3615_v5 = vmul.f32 %v3602_v2, %v3509_v24  ;;  %v3620_v6 = vmul.f32 %v4259_v4, %v3616_v0 }
 0xe90   :  { %v3619_v7 = vmul.f32 %v4259_v4, %v3615_v5  ;;  %v3622_v11 = vsel %vm3489_vm12, %v3620_v6, 0.0 }
 0xe92   :  { %v3621_v8 = vsel %vm3489_vm12, %v3619_v7, 0.0 }
 0xe93   :  { %v3623_v12 = vadd.f32 %v3622_v11, %v3621_v8 }
 0xe95   :  { %3624 = vadd.xlane.f32.xlu0 %v3623_v12 }
 0xf1e   :  { %v3625_v13 = vpop.xlane.xlu0 %3624 }
 0xf1f   :  { %v3626_v14 = vrot.slane %v3625_v13, 4 }
 0xf21   :  { %v3627_v15 = vadd.f32 %v3626_v14, %v3625_v13 }
 0xf23   :  { %v3628_v16 = vrot.slane %v3627_v15, 2 }
 0xf25   :  { %v3629_v17 = vadd.f32 %v3628_v16, %v3627_v15 }
 0xf27   :  { %v3630_v58 = vrot.slane %v3629_v17, 1 }
 0xf29   :  { %v3631_v48 = vadd.f32 %v3630_v58, %v3629_v17 }
 0xf2b   :  { %4148 = vpush %v3631_v48 }
 0xf5c   :  { %s4149_s1 = spop %4148 }
 0xf5d   :  { %3634 = sst [smem:[#allocation2]] %s4149_s1 }
 0xf5e   :  { %3642 = dma.smem_to_hbm %s4273_s29, 16, %s4919_s3, [#allocation3]  }
 0xf5f   :  { %4268 = dma.done.wait [#allocation3], 16  }
 0xf60   :  { %4269 = vsyncadd [#allocation3], 4294967280 }
 0xf61   :  { %3646 = sfence }
 0xf62   :  { %3647 = vsyncpa [#allocation3], 1 }

</bundles_post_ra>
